<compile_context>
chip_gen: v7x
topology: tpu7x:2x2x1
jax: 0.10.0
libtpu: 0.0.40
codegen_flags: <defaults>
</compile_context>

<pallas_src>
import functools

import jax
import jax.numpy as jnp
from jax import lax
from jax.experimental import pallas as pl
from jax.experimental.pallas import tpu as pltpu

BN_EPS = 1e-5


def _round_up(v, m):
    return (v + m - 1) // m * m


# ----------------------------------------------------------------------------
# Pallas kernels.  Every tensor in this net is tiny (<= 512 x 1152 f32), so each
# layer is a single VMEM-resident block: one MXU matmul + fused epilogue.
# ----------------------------------------------------------------------------
def _bn_scale_shift(y, m_valid, gamma, beta):
    """Training-mode (batch-stat) BN scale/shift over the first m_valid rows."""
    rows = lax.broadcasted_iota(jnp.int32, y.shape, 0)
    mask = (rows < m_valid).astype(jnp.float32)
    inv_m = 1.0 / float(m_valid)
    mean = jnp.sum(y * mask, axis=0, keepdims=True) * inv_m
    cent = (y - mean) * mask
    var = jnp.sum(cent * cent, axis=0, keepdims=True) * inv_m
    scale = gamma * lax.rsqrt(var + BN_EPS)
    shift = beta - mean * scale
    return scale, shift


def _mm_bn_relu_kernel(m_valid, x_ref, w_ref, b_ref, g_ref, bt_ref, o_ref):
    y = jnp.dot(x_ref[...], w_ref[...], preferred_element_type=jnp.float32)
    y = y + b_ref[...]
    scale, shift = _bn_scale_shift(y, m_valid, g_ref[...], bt_ref[...])
    o_ref[...] = jnp.maximum(y * scale + shift, 0.0)


def _mm_bn_add_relu_kernel(m_valid, x_ref, w_ref, b_ref, g_ref, bt_ref, r_ref, o_ref):
    y = jnp.dot(x_ref[...], w_ref[...], preferred_element_type=jnp.float32)
    y = y + b_ref[...]
    scale, shift = _bn_scale_shift(y, m_valid, g_ref[...], bt_ref[...])
    o_ref[...] = jnp.maximum(y * scale + shift + r_ref[...], 0.0)


def _mm_bias_kernel(x_ref, w_ref, b_ref, o_ref):
    o_ref[...] = jnp.dot(x_ref[...], w_ref[...],
                         preferred_element_type=jnp.float32) + b_ref[...]


def _mm_attn_kernel(x_ref, w_ref, b_ref, r_ref, o_ref):
    y = jnp.dot(x_ref[...], w_ref[...], preferred_element_type=jnp.float32)
    y = y + b_ref[...]
    x1 = r_ref[...]
    o_ref[...] = x1 * jax.nn.sigmoid(y) + x1


def _max4_kernel(a_ref, b_ref, c_ref, d_ref, o_ref):
    o_ref[...] = jnp.maximum(jnp.maximum(a_ref[...], b_ref[...]),
                             jnp.maximum(c_ref[...], d_ref[...]))


# ----------------------------------------------------------------------------
# Single-block pallas_call wrapper (full-array blocks, grid=(1,))
# ----------------------------------------------------------------------------
def _single_call(kernel, out_shape, *arrays):
    return pl.pallas_call(
        kernel,
        out_shape=out_shape,
        grid=(1,),
        in_specs=[pl.BlockSpec(a.shape, lambda i, n=a.ndim: (0,) * n)
                  for a in arrays],
        out_specs=pl.BlockSpec(out_shape.shape,
                               lambda i, n=len(out_shape.shape): (0,) * n),
        compiler_params=pltpu.CompilerParams(dimension_semantics=("arbitrary",)),
    )(*arrays)


def _fused_linear(xmat, wmat, bias, mode, gamma=None, beta=None, res=None):
    """out = epilogue(xmat @ wmat + bias).  wmat is pre-padded (Kp, N) bf16."""
    M, K = xmat.shape
    Kp, N = wmat.shape
    Mp = _round_up(max(M, 8), 8)
    xp = xmat.astype(jnp.bfloat16)
    if (Mp, Kp) != (M, K):
        xp = jnp.pad(xp, ((0, Mp - M), (0, Kp - K)))
    rp = None
    if res is not None:
        rp = jnp.pad(res, ((0, Mp - M), (0, 0))) if Mp != M else res
    out_shape = jax.ShapeDtypeStruct((Mp, N), jnp.float32)

    if mode == "bn_relu":
        out = _single_call(functools.partial(_mm_bn_relu_kernel, M),
                           out_shape, xp, wmat, bias, gamma, beta)
    elif mode == "bn_add_relu":
        out = _single_call(functools.partial(_mm_bn_add_relu_kernel, M),
                           out_shape, xp, wmat, bias, gamma, beta, rp)
    elif mode == "attn":
        out = _single_call(_mm_attn_kernel, out_shape, xp, wmat, bias, rp)
    else:  # "bias" only (last deconv)
        out = _single_call(_mm_bias_kernel, out_shape, xp, wmat, bias)
    return out[:M] if Mp != M else out


# ----------------------------------------------------------------------------
# JAX glue: patch extraction (im2col) and transposed-conv zero insertion
# ----------------------------------------------------------------------------
def _im2col3x3(x):
    """3x3 / stride 1 / pad 1 patches in bf16: NHWC -> (N*H*W, 9*C)."""
    N, H, W, C = x.shape
    xp = jnp.pad(x.astype(jnp.bfloat16), ((0, 0), (1, 1), (1, 1), (0, 0)))
    cols = [xp[:, di:di + H, dj:dj + W, :] for di in range(3) for dj in range(3)]
    return jnp.concatenate(cols, axis=-1).reshape(N * H * W, 9 * C)


def _upsample_patches(x):
    """ConvTranspose2d(3, stride=2, pad=1, out_pad=1) as zero-insert + im2col."""
    N, H, W, C = x.shape
    up = jnp.zeros((N, 2 * H - 1, 2 * W - 1, C), jnp.bfloat16)
    up = up.at[:, ::2, ::2, :].set(x.astype(jnp.bfloat16))
    up = jnp.pad(up, ((0, 0), (1, 2), (1, 2), (0, 0)))
    Ho, Wo = 2 * H, 2 * W
    cols = [up[:, di:di + Ho, dj:dj + Wo, :] for di in range(3) for dj in range(3)]
    return jnp.concatenate(cols, axis=-1).reshape(N * Ho * Wo, 9 * C), Ho, Wo


# ----------------------------------------------------------------------------
# Layer-level ops (jitted so repeated identical-shape calls reuse compiles)
# ----------------------------------------------------------------------------
@jax.jit
def conv3x3_bn_relu(x, conv, bn):
    """Conv2d(3x3, pad 1, bias) + BatchNorm(batch stats) + ReLU in one kernel."""
    N, H, W, _ = x.shape
    out = _fused_linear(_im2col3x3(x), conv["wmat"], conv["b"], "bn_relu",
                        gamma=bn["gamma"], beta=bn["beta"])
    return out.reshape(N, H, W, -1)


@jax.jit
def bottleneck_fwd(p, x):
    """BottleNeck: 1x1->BN/ReLU -> 3x3->BN/ReLU -> 1x1->BN + residual + ReLU."""
    N, H, W, C = x.shape
    M = N * H * W
    xf = x.reshape(M, C)
    h = _fused_linear(xf, p["conv1"]["wmat"], p["conv1"]["b"], "bn_relu",
                      gamma=p["bn1"]["gamma"], beta=p["bn1"]["beta"])
    h = _fused_linear(_im2col3x3(h.reshape(N, H, W, -1)),
                      p["conv2"]["wmat"], p["conv2"]["b"], "bn_relu",
                      gamma=p["bn2"]["gamma"], beta=p["bn2"]["beta"])
    out = _fused_linear(h, p["conv3"]["wmat"], p["conv3"]["b"], "bn_add_relu",
                        gamma=p["bn3"]["gamma"], beta=p["bn3"]["beta"], res=xf)
    return out.reshape(N, H, W, C)


@functools.partial(jax.jit, static_argnames=("is_last",))
def deconv_fwd(p, x, is_last=False):
    """ConvTranspose2d(3, s=2, p=1, op=1) [+ BN + ReLU unless is_last]."""
    N = x.shape[0]
    patches, Ho, Wo = _upsample_patches(x)
    if is_last:
        out = _fused_linear(patches, p["wmat"], p["b"], "bias")
    else:
        out = _fused_linear(patches, p["wmat"], p["b"], "bn_relu",
                            gamma=p["bn"]["gamma"], beta=p["bn"]["beta"])
    return out.reshape(N, Ho, Wo, -1)


@jax.jit
def maxpool2x2(x):
    """MaxPool2d(2, 2); the reference discards the returned indices."""
    N, H, W, C = x.shape
    a = x[:, 0::2, 0::2, :].reshape(-1, C)
    b = x[:, 0::2, 1::2, :].reshape(-1, C)
    c = x[:, 1::2, 0::2, :].reshape(-1, C)
    d = x[:, 1::2, 1::2, :].reshape(-1, C)
    out = _single_call(_max4_kernel,
                       jax.ShapeDtypeStruct(a.shape, jnp.float32), a, b, c, d)
    return out.reshape(N, H // 2, W // 2, C)


@jax.jit
def attn_tail(x1, x2, conv_fused):
    """x1 * sigmoid(conv2_2(conv2_1(x2))) + x1 : folded 1x1 convs + fused gate."""
    N, H, W, C = x1.shape
    M = N * H * W
    out = _fused_linear(x2.reshape(M, -1), conv_fused["wmat"], conv_fused["b"],
                        "attn", res=x1.reshape(M, C))
    return out.reshape(N, H, W, C)


# ----------------------------------------------------------------------------
# Parameter construction (deterministic, synthetic; pre-laid-out for the kernels)
# ----------------------------------------------------------------------------
class Rng:
    def __init__(self, seed):
        self.key = jax.random.PRNGKey(seed)

    def next(self):
        self.key, sub = jax.random.split(self.key)
        return sub


def _prep_wmat(wmat):
    """Pad the contraction dim to a lane multiple and cast to bf16, once."""
    K, _ = wmat.shape
    Kp = _round_up(K, 128)
    if Kp != K:
        wmat = jnp.pad(wmat, ((0, Kp - K), (0, 0)))
    return wmat.astype(jnp.bfloat16)


def conv_params(rng, cout, cin, k, bias=True):
    """nn.Conv2d(cin, cout, k) weights in matmul layout (k*k*cin [padded], cout)."""
    w = 0.1 * jax.random.normal(rng.next(), (cout, cin, k, k), jnp.float32)
    if k == 1:
        wmat = w.reshape(cout, cin).T
    else:
        wmat = jnp.transpose(w, (2, 3, 1, 0)).reshape(k * k * cin, cout)
    b = (0.1 * jax.random.normal(rng.next(), (cout,), jnp.float32)
         if bias else jnp.zeros((cout,), jnp.float32))
    return {"wmat": _prep_wmat(wmat), "b": b.reshape(1, cout)}


def bn_params(rng, c):
    return {"gamma": 1.0 + 0.1 * jax.random.normal(rng.next(), (1, c), jnp.float32),
            "beta": 0.1 * jax.random.normal(rng.next(), (1, c), jnp.float32)}


def make_bottleneck(rng, inplanes, planes):
    return {
        "conv1": conv_params(rng, planes, inplanes, 1, bias=False),
        "bn1": bn_params(rng, planes),
        "conv2": conv_params(rng, planes, planes, 3, bias=False),
        "bn2": bn_params(rng, planes),
        "conv3": conv_params(rng, planes * 4, planes, 1, bias=False),
        "bn3": bn_params(rng, planes * 4),
    }


def make_deconv(rng, inplanes, planes):
    """nn.ConvTranspose2d(inplanes, planes, 3, 2, 1, 1): flipped-conv matmul layout."""
    w = 0.1 * jax.random.normal(rng.next(), (inplanes, planes, 3, 3), jnp.float32)
    wmat = jnp.transpose(jnp.flip(w, axis=(2, 3)),
                         (2, 3, 0, 1)).reshape(9 * inplanes, planes)
    b = 0.1 * jax.random.normal(rng.next(), (planes,), jnp.float32)
    return {"wmat": _prep_wmat(wmat), "b": b.reshape(1, planes),
            "bn": bn_params(rng, planes)}


def make_attention(rng, inplanes, planes):
    q = planes // 4       # reference uses planes / 4
    # conv2_1 / conv2_2 are back-to-back 1x1 convs with no nonlinearity between
    # them in the reference -> fold algebraically: W = W1 @ W2, b = b1 @ W2 + b2.
    w1 = 0.1 * jax.random.normal(rng.next(), (planes, inplanes, 1, 1), jnp.float32)
    b1 = 0.1 * jax.random.normal(rng.next(), (planes,), jnp.float32)
    w2 = 0.1 * jax.random.normal(rng.next(), (planes, inplanes, 1, 1), jnp.float32)
    b2 = 0.1 * jax.random.normal(rng.next(), (planes,), jnp.float32)
    w1m = w1.reshape(planes, inplanes).T
    w2m = w2.reshape(planes, inplanes).T
    fused = {"wmat": _prep_wmat(w1m @ w2m), "b": (b1 @ w2m + b2).reshape(1, planes)}
    return {
        "b1_1": make_bottleneck(rng, inplanes, q),
        "b1_2": make_bottleneck(rng, inplanes, q),
        "b2_1": make_bottleneck(rng, inplanes, q),
        "b2_2": make_bottleneck(rng, inplanes, q),
        "b2_3": make_bottleneck(rng, inplanes, q),
        "deconv1": make_deconv(rng, inplanes, planes),
        "b2_4": make_bottleneck(rng, inplanes, q),
        "deconv2": make_deconv(rng, inplanes, planes),
        "conv2_fused": fused,
    }


def make_fcn(rng, num_classes):
    return {
        "conv1": conv_params(rng, 32, 3, 3), "bn1": bn_params(rng, 32),
        "conv2": conv_params(rng, 64, 32, 3), "bn2": bn_params(rng, 64),
        "conv3": conv_params(rng, 128, 64, 3), "bn3": bn_params(rng, 128),
        "bottleneck_51": [make_bottleneck(rng, 128, 32) for _ in range(5)],
        "bottleneck_52": [make_bottleneck(rng, 128, 32) for _ in range(5)],
        "deconv1": make_deconv(rng, 128, 64),
        "bottleneck_1": make_bottleneck(rng, 64, 16),
        "attn1": make_attention(rng, 64, 64),
        "deconv2": make_deconv(rng, 64, 32),
        "bottleneck_2": make_bottleneck(rng, 32, 8),
        "attn2": make_attention(rng, 32, 32),
        "deconv3": make_deconv(rng, 32, num_classes),
    }


# ----------------------------------------------------------------------------
# Forward passes (mirror the PyTorch modules)
# ----------------------------------------------------------------------------
def attention_fwd(p, x):
    x1 = bottleneck_fwd(p["b1_1"], x)
    x1 = bottleneck_fwd(p["b1_2"], x1)
    x2 = maxpool2x2(x)
    x2 = bottleneck_fwd(p["b2_1"], x2)
    x2 = maxpool2x2(x2)
    x2 = bottleneck_fwd(p["b2_2"], x2)
    x2 = bottleneck_fwd(p["b2_3"], x2)
    x2 = deconv_fwd(p["deconv1"], x2, is_last=False)
    x2 = bottleneck_fwd(p["b2_4"], x2)
    x2 = deconv_fwd(p["deconv2"], x2, is_last=False)
    out = attn_tail(x1, x2, p["conv2_fused"])    # x1*sigmoid(conv(conv(x2)))+x1
    return x1, out


def fcn_forward(params, x_nchw):
    x = jnp.transpose(x_nchw, (0, 2, 3, 1))                 # NCHW -> NHWC
    x = conv3x3_bn_relu(x, params["conv1"], params["bn1"])
    x = maxpool2x2(x)
    x_1 = conv3x3_bn_relu(x, params["conv2"], params["bn2"])
    x = maxpool2x2(x_1)
    x = conv3x3_bn_relu(x, params["conv3"], params["bn3"])
    x_2 = x
    for bp in params["bottleneck_51"]:
        x_2 = bottleneck_fwd(bp, x_2)
    x = maxpool2x2(x_2)
    for bp in params["bottleneck_52"]:
        x = bottleneck_fwd(bp, x)
    x = deconv_fwd(params["deconv1"], x, is_last=False)
    x = bottleneck_fwd(params["bottleneck_1"], x)
    b_x1, x1 = attention_fwd(params["attn1"], x)
    x = deconv_fwd(params["deconv2"], x1, is_last=False)
    x = bottleneck_fwd(params["bottleneck_2"], x)
    b_x2, x2 = attention_fwd(params["attn2"], x)
    x_out = deconv_fwd(params["deconv3"], x2, is_last=True)
    to_nchw = lambda t: jnp.transpose(t, (0, 3, 1, 2))      # back to PyTorch layout
    return (to_nchw(b_x1), to_nchw(x1), to_nchw(b_x2), to_nchw(x2), to_nchw(x_out))


# ----------------------------------------------------------------------------
if __name__ == "__main__":
    num_classes = 5
    rng = Rng(0)
    params = make_fcn(rng, num_classes)

    x = jax.random.normal(jax.random.PRNGKey(0), (2, 3, 16, 16), jnp.float32)

    outs = fcn_forward(params, x)
    outs = jax.block_until_ready(outs)

    expected = [(2, 64, 4, 4), (2, 64, 4, 4), (2, 32, 8, 8), (2, 32, 8, 8),
                (2, num_classes, 16, 16)]
    assert [tuple(o.shape) for o in outs] == expected, \
        [tuple(o.shape) for o in outs]
    assert all(bool(jnp.all(jnp.isfinite(o))) for o in outs)
    print("KERNEL_OK")
</pallas_src>

<mosaic_0001>
module attributes {stable_mosaic.version = 11 : i64} {
  func.func @_mm_bn_relu_kernel(%arg0: i32, %arg1: memref<512x128xbf16, #tpu.memory_space<vmem>>, %arg2: memref<128x32xbf16, #tpu.memory_space<vmem>>, %arg3: memref<1x32xf32, #tpu.memory_space<vmem>>, %arg4: memref<1x32xf32, #tpu.memory_space<vmem>>, %arg5: memref<1x32xf32, #tpu.memory_space<vmem>>, %arg6: memref<512x32xf32, #tpu.memory_space<vmem>>) attributes {dimension_semantics = [#tpu.dimension_semantics<arbitrary>], iteration_bounds = array<i64: 1>, scalar_prefetch = 0 : i64, scratch_operands = 0 : i64, tpu.core_type = #tpu.core_type<tc>, window_params = [{pipeline_mode = #tpu.pipeline_mode<synchronous>, transform_indices = @transform_0, window_bounds = array<i64: 512, 128>}, {pipeline_mode = #tpu.pipeline_mode<synchronous>, transform_indices = @transform_1, window_bounds = array<i64: 128, 32>}, {pipeline_mode = #tpu.pipeline_mode<synchronous>, transform_indices = @transform_2, window_bounds = array<i64: 1, 32>}, {pipeline_mode = #tpu.pipeline_mode<synchronous>, transform_indices = @transform_3, window_bounds = array<i64: 1, 32>}, {pipeline_mode = #tpu.pipeline_mode<synchronous>, transform_indices = @transform_4, window_bounds = array<i64: 1, 32>}, {pipeline_mode = #tpu.pipeline_mode<synchronous>, transform_indices = @transform_5, window_bounds = array<i64: 512, 32>}]} {
    %c0 = arith.constant 0 : index
    %c0_0 = arith.constant 0 : index
    %0 = vector.load %arg1[%c0, %c0_0] : memref<512x128xbf16, #tpu.memory_space<vmem>>, vector<512x128xbf16>
    %c0_1 = arith.constant 0 : index
    %c0_2 = arith.constant 0 : index
    %1 = vector.load %arg2[%c0_1, %c0_2] : memref<128x32xbf16, #tpu.memory_space<vmem>>, vector<128x32xbf16>
    %cst = arith.constant dense<0.000000e+00> : vector<512x32xf32>
    %2 = tpu.matmul %0, %1, %cst {dimension_numbers = #tpu.dot_dimension_numbers<[1], [0], [0], [1], [0, 0, 1, 1], [], []>} : vector<512x128xbf16>, vector<128x32xbf16>, vector<512x32xf32> -> vector<512x32xf32>
    %c0_3 = arith.constant 0 : index
    %c0_4 = arith.constant 0 : index
    %3 = vector.load %arg3[%c0_3, %c0_4] : memref<1x32xf32, #tpu.memory_space<vmem>>, vector<1x32xf32>
    %4 = vector.broadcast %3 : vector<1x32xf32> to vector<512x32xf32>
    %5 = arith.addf %2, %4 : vector<512x32xf32>
    %c0_5 = arith.constant 0 : index
    %c0_6 = arith.constant 0 : index
    %6 = vector.load %arg4[%c0_5, %c0_6] : memref<1x32xf32, #tpu.memory_space<vmem>>, vector<1x32xf32>
    %c0_7 = arith.constant 0 : index
    %c0_8 = arith.constant 0 : index
    %7 = vector.load %arg5[%c0_7, %c0_8] : memref<1x32xf32, #tpu.memory_space<vmem>>, vector<1x32xf32>
    %8 = tpu.iota {dimensions = array<i32: 0>} : vector<512x32xi32>
    %c512_i32 = arith.constant 512 : i32
    %9 = vector.broadcast %c512_i32 : i32 to vector<512x32xi32>
    %10 = arith.cmpi slt, %8, %9 : vector<512x32xi32>
    %11 = arith.extui %10 : vector<512x32xi1> to vector<512x32xi32>
    %12 = arith.sitofp %11 : vector<512x32xi32> to vector<512x32xf32>
    %13 = arith.mulf %5, %12 : vector<512x32xf32>
    %cst_9 = arith.constant dense<0.000000e+00> : vector<32xf32>
    %14 = vector.multi_reduction <add>, %13, %cst_9 [0] : vector<512x32xf32> to vector<32xf32>
    %15 = vector.shape_cast %14 : vector<32xf32> to vector<1x32xf32>
    %cst_10 = arith.constant 0.001953125 : f32
    %16 = vector.broadcast %cst_10 : f32 to vector<1x32xf32>
    %17 = arith.mulf %15, %16 : vector<1x32xf32>
    %18 = vector.broadcast %17 : vector<1x32xf32> to vector<512x32xf32>
    %19 = arith.subf %5, %18 : vector<512x32xf32>
    %20 = arith.mulf %19, %12 : vector<512x32xf32>
    %21 = arith.mulf %20, %20 : vector<512x32xf32>
    %cst_11 = arith.constant dense<0.000000e+00> : vector<32xf32>
    %22 = vector.multi_reduction <add>, %21, %cst_11 [0] : vector<512x32xf32> to vector<32xf32>
    %23 = vector.shape_cast %22 : vector<32xf32> to vector<1x32xf32>
    %cst_12 = arith.constant 0.001953125 : f32
    %24 = vector.broadcast %cst_12 : f32 to vector<1x32xf32>
    %25 = arith.mulf %23, %24 : vector<1x32xf32>
    %cst_13 = arith.constant 9.99999974E-6 : f32
    %26 = vector.broadcast %cst_13 : f32 to vector<1x32xf32>
    %27 = arith.addf %25, %26 : vector<1x32xf32>
    %28 = math.rsqrt %27 : vector<1x32xf32>
    %29 = arith.mulf %6, %28 : vector<1x32xf32>
    %30 = arith.mulf %17, %29 : vector<1x32xf32>
    %31 = arith.subf %7, %30 : vector<1x32xf32>
    %32 = vector.broadcast %29 : vector<1x32xf32> to vector<512x32xf32>
    %33 = arith.mulf %5, %32 : vector<512x32xf32>
    %34 = vector.broadcast %31 : vector<1x32xf32> to vector<512x32xf32>
    %35 = arith.addf %33, %34 : vector<512x32xf32>
    %cst_14 = arith.constant 0.000000e+00 : f32
    %36 = vector.broadcast %cst_14 : f32 to vector<512x32xf32>
    %37 = arith.maximumf %35, %36 : vector<512x32xf32>
    %c0_15 = arith.constant 0 : index
    %c0_16 = arith.constant 0 : index
    %38 = vector.load %arg6[%c0_15, %c0_16] : memref<512x32xf32, #tpu.memory_space<vmem>>, vector<512x32xf32>
    tpu.vector_store %arg6[%c0_15, %c0_16], %37 {strides = array<i32>} : memref<512x32xf32, #tpu.memory_space<vmem>>, vector<512x32xf32>,
    return
  }
  func.func @transform_0(%arg0: i32) -> (i32, i32) {
    %c0_i32 = arith.constant 0 : i32
    %c0_i32_0 = arith.constant 0 : i32
    %c0_i32_1 = arith.constant 0 : i32
    return %c0_i32, %c0_i32_0 : i32, i32
  }
  func.func @transform_1(%arg0: i32) -> (i32, i32) {
    %c0_i32 = arith.constant 0 : i32
    %c0_i32_0 = arith.constant 0 : i32
    %c0_i32_1 = arith.constant 0 : i32
    return %c0_i32, %c0_i32_0 : i32, i32
  }
  func.func @transform_2(%arg0: i32) -> (i32, i32) {
    %c0_i32 = arith.constant 0 : i32
    %c0_i32_0 = arith.constant 0 : i32
    %c0_i32_1 = arith.constant 0 : i32
    return %c0_i32, %c0_i32_0 : i32, i32
  }
  func.func @transform_3(%arg0: i32) -> (i32, i32) {
    %c0_i32 = arith.constant 0 : i32
    %c0_i32_0 = arith.constant 0 : i32
    %c0_i32_1 = arith.constant 0 : i32
    return %c0_i32, %c0_i32_0 : i32, i32
  }
  func.func @transform_4(%arg0: i32) -> (i32, i32) {
    %c0_i32 = arith.constant 0 : i32
    %c0_i32_0 = arith.constant 0 : i32
    %c0_i32_1 = arith.constant 0 : i32
    return %c0_i32, %c0_i32_0 : i32, i32
  }
  func.func @transform_5(%arg0: i32) -> (i32, i32) {
    %c0_i32 = arith.constant 0 : i32
    %c0_i32_0 = arith.constant 0 : i32
    %c0_i32_1 = arith.constant 0 : i32
    return %c0_i32, %c0_i32_0 : i32, i32
  }
}

</mosaic_0001>

<bundles_post_ra>
// kernel: conv3x3_bn_relu.1
= control target key start
LH: loop header
LB: loop body
LE: loop exit
PB: predicated region body
PF: predicated region fallthrough
CT: control target
= control target key end

     0   :  { %s3296_s0 = inlined_call_operand.vmem [shape: bf16[512,128], index: 0, kind: input, shape index: {}]   ;;  %s3297_s1 = inlined_call_operand.vmem [shape: bf16[128,32], index: 1, kind: input, shape index: {}]   ;;  %s3298_s2 = inlined_call_operand.vmem [shape: f32[1,32], index: 2, kind: input, shape index: {}]   ;;  %s3299_s3 = inlined_call_operand.vmem [shape: f32[1,32], index: 3, kind: input, shape index: {}]   ;;  %s3300_s4 = inlined_call_operand.vmem [shape: f32[1,32], index: 4, kind: input, shape index: {}]   ;;  %s3301_s5 = inlined_call_operand.hbm [shape: f32[512,32], index: 5, kind: output, shape index: {}]  }
   0x1   :  { %v1891_v0 = vld [vmem:[%s3297_s1] sm:$0xff]   ;;  %v1892_v1 = vld [vmem:[%s3297_s1 + $0x8] sm:$0xff]   ;;  %v1893_v2 = vld [vmem:[%s3297_s1 + $0x10] sm:$0xff]  }
   0x2   :  { %1792 = vmatprep.subr.bf16.mxu0 %v1891_v0  ;;  %1872 = vmatprep.subr.bf16.mxu1 %v1891_v0  ;;  %v1894_v3 = vld [vmem:[%s3297_s1 + $0x18] sm:$0xff]   ;;  %v1899_v4 = vld [vmem:[%s3296_s0] sm:$0xff]   ;;  %v1896_v6 = vld [vmem:[%s3297_s1 + $0x28] sm:$0xff]  }
   0x3   :  { %1793 = vmatpush3.bf16.msra.mxu0 %v1891_v0  ;;  %1880 = vmatpush3.bf16.msra.mxu1 %v1891_v0  ;;  %v1895_v5 = vld [vmem:[%s3297_s1 + $0x20] sm:$0xff]   ;;  %v1897_v7 = vld [vmem:[%s3297_s1 + $0x30] sm:$0xff]   ;;  %v1898_v8 = vld [vmem:[%s3297_s1 + $0x38] sm:$0xff]  }
   0x4   :  { %1794 = vmatprep.subr.bf16.mxu0 %v1892_v1  ;;  %1873 = vmatprep.subr.bf16.mxu1 %v1892_v1  ;;  %v1915_v9 = vld [vmem:[%s3296_s0 + $0x80] sm:$0xff]   ;;  %v1900_v10 = vld [vmem:[%s3296_s0 + $0x8] sm:$0xff]   ;;  %v1901_v11 = vld [vmem:[%s3296_s0 + $0x10] sm:$0xff]  }
   0x5   :  { %1808 = vmatprep.mubr.bf16.mxu0 %v1899_v4  ;;  %1840 = vmatprep.mubr.bf16.mxu1 %v1915_v9  ;;  %v1916_v12 = vld [vmem:[%s3296_s0 + $0x88] sm:$0xff]   ;;  %v1917_v13 = vld [vmem:[%s3296_s0 + $0x90] sm:$0xff]   ;;  %v1902_v14 = vld [vmem:[%s3296_s0 + $0x18] sm:$0xff]  }
   0x6   :  { %v1903_v15 = vld [vmem:[%s3296_s0 + $0x20] sm:$0xff]   ;;  %v1918_v16 = vld [vmem:[%s3296_s0 + $0x98] sm:$0xff]  }
   0x7   :  { %1795 = vmatpush3.bf16.msra.mxu0 %v1892_v1  ;;  %1881 = vmatpush3.bf16.msra.mxu1 %v1892_v1  ;;  %v1919_v17 = vld [vmem:[%s3296_s0 + $0xa0] sm:$0xff]  }
   0x8   :  { %1796 = vmatprep.subr.bf16.mxu0 %v1893_v2  ;;  %1874 = vmatprep.subr.bf16.mxu1 %v1893_v2 }
   0xb   :  { %1797 = vmatpush3.bf16.msra.mxu0 %v1893_v2  ;;  %1882 = vmatpush3.bf16.msra.mxu1 %v1893_v2 }
   0xc   :  { %1798 = vmatprep.subr.bf16.mxu0 %v1894_v3  ;;  %1875 = vmatprep.subr.bf16.mxu1 %v1894_v3 }
   0xf   :  { %1799 = vmatpush3.bf16.msra.mxu0 %v1894_v3  ;;  %1883 = vmatpush3.bf16.msra.mxu1 %v1894_v3 }
  0x10   :  { %1800 = vmatprep.subr.bf16.mxu0 %v1895_v5  ;;  %1876 = vmatprep.subr.bf16.mxu1 %v1895_v5 }
  0x13   :  { %1801 = vmatpush3.bf16.msra.mxu0 %v1895_v5  ;;  %1884 = vmatpush3.bf16.msra.mxu1 %v1895_v5 }
  0x14   :  { %1802 = vmatprep.subr.bf16.mxu0 %v1896_v6  ;;  %1877 = vmatprep.subr.bf16.mxu1 %v1896_v6 }
  0x17   :  { %1803 = vmatpush3.bf16.msra.mxu0 %v1896_v6  ;;  %1885 = vmatpush3.bf16.msra.mxu1 %v1896_v6 }
  0x18   :  { %1804 = vmatprep.subr.bf16.mxu0 %v1897_v7  ;;  %1878 = vmatprep.subr.bf16.mxu1 %v1897_v7 }
  0x1b   :  { %1805 = vmatpush3.bf16.msra.mxu0 %v1897_v7  ;;  %1886 = vmatpush3.bf16.msra.mxu1 %v1897_v7 }
  0x1c   :  { %1806 = vmatprep.subr.bf16.mxu0 %v1898_v8  ;;  %1879 = vmatprep.subr.bf16.mxu1 %v1898_v8 }
  0x1f   :  { %1807 = vmatpush3.bf16.msra.mxu0 %v1898_v8  ;;  %1887 = vmatpush3.bf16.msra.mxu1 %v1898_v8 }
  0x22   :  { %1809 = vmatmul.mubr.bf16.vlgmr.msra.gmra.mrb[0].mxu0 %v1900_v10  ;;  %1841 = vmatmul.mubr.bf16.vlgmr.msra.gmra.mrb[0].mxu1 %v1916_v12 }
  0x23   :  { %1812 = vmatprep.mubr.bf16.mxu0 %v1901_v11  ;;  %1844 = vmatprep.mubr.bf16.mxu1 %v1917_v13 }
  0x24   :  { %10 = vsyncpa [#allocation3], 0  ;;  %v1904_v18 = vld [vmem:[%s3296_s0 + $0x28] sm:$0xff]   ;;  %v1905_v20 = vld [vmem:[%s3296_s0 + $0x30] sm:$0xff]   ;;  %vm961_vm0 = vcmask 261120  }
  0x25   :  { %v1920_v19 = vld [vmem:[%s3296_s0 + $0xa8] sm:$0xff]   ;;  %v1921_v21 = vld [vmem:[%s3296_s0 + $0xb0] sm:$0xff]   ;;  %v1906_v22 = vld [vmem:[%s3296_s0 + $0x38] sm:$0xff]  }
  0x26   :  { %v1922_v23 = vld [vmem:[%s3296_s0 + $0xb8] sm:$0xff]   ;;  %v1907_v24 = vld [vmem:[%s3296_s0 + $0x40] sm:$0xff]   ;;  %v1908_v26 = vld [vmem:[%s3296_s0 + $0x48] sm:$0xff]  }
  0x27   :  { %v1923_v25 = vld [vmem:[%s3296_s0 + $0xc0] sm:$0xff]   ;;  %v1924_v27 = vld [vmem:[%s3296_s0 + $0xc8] sm:$0xff]   ;;  %v1909_v28 = vld [vmem:[%s3296_s0 + $0x50] sm:$0xff]  }
  0x28   :  { %v1925_v29 = vld [vmem:[%s3296_s0 + $0xd0] sm:$0xff]   ;;  %v1910_v30 = vld [vmem:[%s3296_s0 + $0x58] sm:$0xff]   ;;  %v1911_v32 = vld [vmem:[%s3296_s0 + $0x60] sm:$0xff]  }
  0x29   :  { %v1926_v31 = vld [vmem:[%s3296_s0 + $0xd8] sm:$0xff]   ;;  %v1927_v33 = vld [vmem:[%s3296_s0 + $0xe0] sm:$0xff]   ;;  %v1912_v34 = vld [vmem:[%s3296_s0 + $0x68] sm:$0xff]  }
  0x2a   :  { %1813 = vmatmul.mubr.bf16.gmra.mrb[4].mxu0 %v1902_v14  ;;  %1845 = vmatmul.mubr.bf16.gmra.mrb[4].mxu1 %v1918_v16  ;;  %v1928_v35 = vld [vmem:[%s3296_s0 + $0xe8] sm:$0xff]   ;;  %v1913_v36 = vld [vmem:[%s3296_s0 + $0x70] sm:$0xff]   ;;  %v1914_v38 = vld [vmem:[%s3296_s0 + $0x78] sm:$0xff]  }
  0x2b   :  { %1816 = vmatprep.mubr.bf16.mxu0 %v1903_v15  ;;  %1848 = vmatprep.mubr.bf16.mxu1 %v1919_v17  ;;  %v1929_v37 = vld [vmem:[%s3296_s0 + $0xf0] sm:$0xff]   ;;  %v1930_v39 = vld [vmem:[%s3296_s0 + $0xf8] sm:$0xff]   ;;  %v2113_v40 = vld [vmem:[%s3298_s2] ss:$0 sm:$0xff] }
  0x32   :  { %1817 = vmatmul.mubr.bf16.gmra.mrb[8].mxu0 %v1904_v18  ;;  %1849 = vmatmul.mubr.bf16.gmra.mrb[8].mxu1 %v1920_v19 }
  0x33   :  { %1820 = vmatprep.mubr.bf16.mxu0 %v1905_v20  ;;  %1852 = vmatprep.mubr.bf16.mxu1 %v1921_v21 }
  0x3a   :  { %1821 = vmatmul.mubr.bf16.gmra.mrb[12].mxu0 %v1906_v22  ;;  %1853 = vmatmul.mubr.bf16.gmra.mrb[12].mxu1 %v1922_v23 }
  0x3b   :  { %1824 = vmatprep.mubr.bf16.mxu0 %v1907_v24  ;;  %1856 = vmatprep.mubr.bf16.mxu1 %v1923_v25 }
  0x42   :  { %1825 = vmatmul.mubr.bf16.gmra.mrb[16].mxu0 %v1908_v26  ;;  %1857 = vmatmul.mubr.bf16.gmra.mrb[16].mxu1 %v1924_v27 }
  0x43   :  { %1828 = vmatprep.mubr.bf16.mxu0 %v1909_v28  ;;  %1860 = vmatprep.mubr.bf16.mxu1 %v1925_v29 }
  0x4a   :  { %1829 = vmatmul.mubr.bf16.gmra.mrb[20].mxu0 %v1910_v30  ;;  %1861 = vmatmul.mubr.bf16.gmra.mrb[20].mxu1 %v1926_v31 }
  0x4b   :  { %1832 = vmatprep.mubr.bf16.mxu0 %v1911_v32  ;;  %1864 = vmatprep.mubr.bf16.mxu1 %v1927_v33 }
  0x52   :  { %1833 = vmatmul.mubr.bf16.gmra.mrb[24].mxu0 %v1912_v34  ;;  %1865 = vmatmul.mubr.bf16.gmra.mrb[24].mxu1 %v1928_v35 }
  0x53   :  { %1836 = vmatprep.mubr.bf16.mxu0 %v1913_v36  ;;  %1868 = vmatprep.mubr.bf16.mxu1 %v1929_v37 }
  0x5a   :  { %1837 = vmatmul.mubr.bf16.gmra.mrb[28].mxu0 %v1914_v38  ;;  %1869 = vmatmul.mubr.bf16.gmra.mrb[28].mxu1 %v1930_v39 }
  0xf5   :  { %v1810_v41 = vpop.f32.mrb[0].mxu0  ;;  %v1842_v42 = vpop.f32.mrb[0].mxu1 }
  0xf6   :  { %v383_v43 = vpop.f32.mrb[1].mxu0  ;;  %v2116_v44 = vadd.f32 %v1842_v42, %v2113_v40  ;;  %v2118_v45 = vpop.f32.mrb[1].mxu1  ;;  %v2127_v52 = vadd.f32 %v1810_v41, %v2113_v40 }
  0xf7   :  { %v2121_v46 = vadd.f32 %v2113_v40, %v383_v43  ;;  %v1811_v47 = vpop.f32.mrb[2].mxu0  ;;  %v1843_v48 = vpop.f32.mrb[2].mxu1 }
  0xf8   :  { %v386_v49 = vpop.f32.mrb[3].mxu0  ;;  %v2124_v50 = vadd.f32 %v1843_v48, %v2113_v40  ;;  %v514_v51 = vpop.f32.mrb[3].mxu1  ;;  %v2138_v56 = vadd.f32 %v1811_v47, %v2113_v40  ;;  %v965_v59 = vsel %vm961_vm0, %v2127_v52, 0.0 }
  0xf9   :  { %v2130_v53 = vadd.f32 %v2113_v40, %v386_v49  ;;  %v2133_v54 = vadd.f32 %v2113_v40, %v514_v51  ;;  %v962_v55 = vsel %vm961_vm0, %v2121_v46, 0.0 }
  0xfa   :  { %3345 = vst [vmem:[#allocation5_spill] sm:$0xff] %v2138_v56  ;;  %v967_v2 = vsel %vm961_vm0, %v2138_v56, 0.0 }
  0xfb   :  { %v963_v57 = vsel %vm961_vm0, %v2130_v53, 0.0 }
  0xfc   :  { %v964_v58 = vadd.f32 %v963_v57, %v962_v55 }
  0xfd   :  { %v1814_v60 = vpop.f32.mrb[4].mxu0  ;;  %v1846_v61 = vpop.f32.mrb[4].mxu1 }
  0xfe   :  { %v966_v62 = vadd.f32 %v965_v59, %v964_v58  ;;  %v399_v63 = vpop.f32.mrb[5].mxu0  ;;  %v2145_v0 = vadd.f32 %v1846_v61, %v2113_v40  ;;  %v527_v1 = vpop.f32.mrb[5].mxu1  ;;  %v2156_v10 = vadd.f32 %v1814_v60, %v2113_v40 }
  0xff   :  { %v2150_v3 = vadd.f32 %v2113_v40, %v399_v63  ;;  %v1815_v4 = vpop.f32.mrb[6].mxu0  ;;  %v2153_v5 = vadd.f32 %v2113_v40, %v527_v1  ;;  %v1847_v6 = vpop.f32.mrb[6].mxu1 }
 0x100   :  { %v968_v7 = vadd.f32 %v967_v2, %v966_v62  ;;  %v402_v8 = vpop.f32.mrb[7].mxu0  ;;  %v530_v9 = vpop.f32.mrb[7].mxu1  ;;  %v2164_v13 = vadd.f32 %v1847_v6, %v2113_v40  ;;  %v2170_v16 = vadd.f32 %v1815_v4, %v2113_v40  ;;  %v973_v19 = vsel %vm961_vm0, %v2156_v10, 0.0 }
 0x101   :  { %3346 = vst [vmem:[#allocation6_spill] sm:$0xff] %v2150_v3  ;;  %v969_v11 = vsel %vm961_vm0, %v2150_v3, 0.0  ;;  %v2161_v12 = vadd.f32 %v2113_v40, %v402_v8  ;;  %v2167_v15 = vadd.f32 %v2113_v40, %v530_v9 }
 0x102   :  { %v970_v14 = vadd.f32 %v969_v11, %v968_v7  ;;  %v975_v26 = vsel %vm961_vm0, %v2170_v16, 0.0 }
 0x103   :  { %3347 = vst [vmem:[#allocation7_spill] sm:$0xff] %v2161_v12  ;;  %v971_v17 = vsel %vm961_vm0, %v2161_v12, 0.0 }
 0x104   :  { %v972_v18 = vadd.f32 %v971_v17, %v970_v14 }
 0x105   :  { %v1818_v20 = vpop.f32.mrb[8].mxu0  ;;  %v1850_v21 = vpop.f32.mrb[8].mxu1 }
 0x106   :  { %v974_v22 = vadd.f32 %v973_v19, %v972_v18  ;;  %v415_v23 = vpop.f32.mrb[9].mxu0  ;;  %v2177_v24 = vadd.f32 %v1850_v21, %v2113_v40  ;;  %v543_v25 = vpop.f32.mrb[9].mxu1  ;;  %v2188_v34 = vadd.f32 %v1818_v20, %v2113_v40 }
 0x107   :  { %v2182_v27 = vadd.f32 %v2113_v40, %v415_v23  ;;  %v1819_v28 = vpop.f32.mrb[10].mxu0  ;;  %v2185_v29 = vadd.f32 %v2113_v40, %v543_v25  ;;  %v1851_v30 = vpop.f32.mrb[10].mxu1 }
 0x108   :  { %v976_v31 = vadd.f32 %v975_v26, %v974_v22  ;;  %v418_v32 = vpop.f32.mrb[11].mxu0  ;;  %v546_v33 = vpop.f32.mrb[11].mxu1  ;;  %v2196_v37 = vadd.f32 %v1851_v30, %v2113_v40  ;;  %v2202_v41 = vadd.f32 %v1819_v28, %v2113_v40  ;;  %v981_v47 = vsel %vm961_vm0, %v2188_v34, 0.0 }
 0x109   :  { %v977_v35 = vsel %vm961_vm0, %v2182_v27, 0.0  ;;  %v2193_v36 = vadd.f32 %v2113_v40, %v418_v32  ;;  %v2199_v39 = vadd.f32 %v2113_v40, %v546_v33 }
 0x10a   :  { %v978_v38 = vadd.f32 %v977_v35, %v976_v31  ;;  %v983_v59 = vsel %vm961_vm0, %v2202_v41, 0.0 }
 0x10b   :  { %v979_v42 = vsel %vm961_vm0, %v2193_v36, 0.0 }
 0x10c   :  { %v980_v43 = vadd.f32 %v979_v42, %v978_v38 }
 0x10d   :  { %v1822_v48 = vpop.f32.mrb[12].mxu0  ;;  %v1854_v49 = vpop.f32.mrb[12].mxu1 }
 0x10e   :  { %v982_v51 = vadd.f32 %v981_v47, %v980_v43  ;;  %v431_v55 = vpop.f32.mrb[13].mxu0  ;;  %v2209_v57 = vadd.f32 %v1854_v49, %v2113_v40  ;;  %v559_v58 = vpop.f32.mrb[13].mxu1  ;;  %v2220_v6 = vadd.f32 %v1822_v48, %v2113_v40 }
 0x10f   :  { %v2214_v60 = vadd.f32 %v2113_v40, %v431_v55  ;;  %v1823_v61 = vpop.f32.mrb[14].mxu0  ;;  %v2217_v62 = vadd.f32 %v2113_v40, %v559_v58  ;;  %v1855_v63 = vpop.f32.mrb[14].mxu1 }
 0x110   :  { %v984_v1 = vadd.f32 %v983_v59, %v982_v51  ;;  %v434_v2 = vpop.f32.mrb[15].mxu0  ;;  %v562_v4 = vpop.f32.mrb[15].mxu1  ;;  %3348 = vst [vmem:[#allocation8_spill] sm:$0xff] %v2220_v6  ;;  %v2228_v9 = vadd.f32 %v1855_v63, %v2113_v40  ;;  %v2234_v17 = vadd.f32 %v1823_v61, %v2113_v40  ;;  %v989_v20 = vsel %vm961_vm0, %v2220_v6, 0.0 }
 0x111   :  { %v985_v7 = vsel %vm961_vm0, %v2214_v60, 0.0  ;;  %v2225_v8 = vadd.f32 %v2113_v40, %v434_v2  ;;  %v2231_v14 = vadd.f32 %v2113_v40, %v562_v4 }
 0x112   :  { %v986_v11 = vadd.f32 %v985_v7, %v984_v1  ;;  %3349 = vst [vmem:[#allocation9_spill] sm:$0xff] %v2234_v17  ;;  %v991_v30 = vsel %vm961_vm0, %v2234_v17, 0.0 }
 0x113   :  { %v987_v18 = vsel %vm961_vm0, %v2225_v8, 0.0 }
 0x114   :  { %v988_v19 = vadd.f32 %v987_v18, %v986_v11 }
 0x115   :  { %v1826_v21 = vpop.f32.mrb[16].mxu0  ;;  %v1858_v22 = vpop.f32.mrb[16].mxu1 }
 0x116   :  { %v990_v23 = vadd.f32 %v989_v20, %v988_v19  ;;  %v447_v25 = vpop.f32.mrb[17].mxu0  ;;  %v2241_v26 = vadd.f32 %v1858_v22, %v2113_v40  ;;  %v575_v28 = vpop.f32.mrb[17].mxu1  ;;  %v2252_v47 = vadd.f32 %v1826_v21, %v2113_v40 }
 0x117   :  { %v2246_v31 = vadd.f32 %v2113_v40, %v447_v25  ;;  %v1827_v32 = vpop.f32.mrb[18].mxu0  ;;  %v2249_v33 = vadd.f32 %v2113_v40, %v575_v28  ;;  %v1859_v35 = vpop.f32.mrb[18].mxu1 }
 0x118   :  { %v992_v38 = vadd.f32 %v991_v30, %v990_v23  ;;  %v450_v42 = vpop.f32.mrb[19].mxu0  ;;  %v578_v43 = vpop.f32.mrb[19].mxu1  ;;  %3351 = vst [vmem:[#allocation11_spill] sm:$0xff] %v2252_v47  ;;  %v2260_v51 = vadd.f32 %v1859_v35, %v2113_v40  ;;  %v2266_v59 = vadd.f32 %v1827_v32, %v2113_v40  ;;  %v997_v1 = vsel %vm961_vm0, %v2252_v47, 0.0 }
 0x119   :  { %3350 = vst [vmem:[#allocation10_spill] sm:$0xff] %v2246_v31  ;;  %v993_v48 = vsel %vm961_vm0, %v2246_v31, 0.0  ;;  %v2257_v49 = vadd.f32 %v2113_v40, %v450_v42  ;;  %v2263_v58 = vadd.f32 %v2113_v40, %v578_v43 }
 0x11a   :  { %v994_v55 = vadd.f32 %v993_v48, %v992_v38  ;;  %3353 = vst [vmem:[#allocation13_spill] sm:$0xff] %v2266_v59  ;;  %v999_v20 = vsel %vm961_vm0, %v2266_v59, 0.0 }
 0x11b   :  { %3352 = vst [vmem:[#allocation12_spill] sm:$0xff] %v2257_v49  ;;  %v995_v61 = vsel %vm961_vm0, %v2257_v49, 0.0 }
 0x11c   :  { %v996_v63 = vadd.f32 %v995_v61, %v994_v55 }
 0x11d   :  { %v1830_v2 = vpop.f32.mrb[20].mxu0  ;;  %v1862_v4 = vpop.f32.mrb[20].mxu1 }
 0x11e   :  { %v998_v7 = vadd.f32 %v997_v1, %v996_v63  ;;  %v463_v11 = vpop.f32.mrb[21].mxu0  ;;  %v2273_v18 = vadd.f32 %v1862_v4, %v2113_v40  ;;  %v591_v19 = vpop.f32.mrb[21].mxu1  ;;  %v2284_v35 = vadd.f32 %v1830_v2, %v2113_v40 }
 0x11f   :  { %v2278_v21 = vadd.f32 %v2113_v40, %v463_v11  ;;  %v1831_v22 = vpop.f32.mrb[22].mxu0  ;;  %v2281_v23 = vadd.f32 %v2113_v40, %v591_v19  ;;  %v1863_v25 = vpop.f32.mrb[22].mxu1 }
 0x120   :  { %v1000_v28 = vadd.f32 %v999_v20, %v998_v7  ;;  %v466_v30 = vpop.f32.mrb[23].mxu0  ;;  %v594_v32 = vpop.f32.mrb[23].mxu1  ;;  %3355 = vst [vmem:[#allocation15_spill] sm:$0xff] %v2284_v35  ;;  %v2292_v43 = vadd.f32 %v1863_v25, %v2113_v40  ;;  %v2298_v61 = vadd.f32 %v1831_v22, %v2113_v40  ;;  %v1005_v2 = vsel %vm961_vm0, %v2284_v35, 0.0 }
 0x121   :  { %3354 = vst [vmem:[#allocation14_spill] sm:$0xff] %v2278_v21  ;;  %v1001_v38 = vsel %vm961_vm0, %v2278_v21, 0.0  ;;  %v2289_v42 = vadd.f32 %v2113_v40, %v466_v30  ;;  %v2295_v55 = vadd.f32 %v2113_v40, %v594_v32 }
 0x122   :  { %3357 = vst [vmem:[#allocation17_spill] sm:$0xff] %v2292_v43  ;;  %v1002_v48 = vadd.f32 %v1001_v38, %v1000_v28  ;;  %3358 = vst [vmem:[#allocation18_spill] sm:$0xff] %v2298_v61  ;;  %v1007_v28 = vsel %vm961_vm0, %v2298_v61, 0.0 }
 0x123   :  { %3356 = vst [vmem:[#allocation16_spill] sm:$0xff] %v2289_v42  ;;  %v1003_v63 = vsel %vm961_vm0, %v2289_v42, 0.0 }
 0x124   :  { %v1004_v1 = vadd.f32 %v1003_v63, %v1002_v48 }
 0x125   :  { %v1834_v4 = vpop.f32.mrb[24].mxu0  ;;  %v1866_v7 = vpop.f32.mrb[24].mxu1 }
 0x126   :  { %v1006_v11 = vadd.f32 %v1005_v2, %v1004_v1  ;;  %v479_v19 = vpop.f32.mrb[25].mxu0  ;;  %v2305_v20 = vadd.f32 %v1866_v7, %v2113_v40  ;;  %v607_v25 = vpop.f32.mrb[25].mxu1  ;;  %v2316_v1 = vadd.f32 %v1834_v4, %v2113_v40 }
 0x127   :  { %v2310_v22 = vadd.f32 %v2113_v40, %v479_v19  ;;  %v1835_v30 = vpop.f32.mrb[26].mxu0  ;;  %v2313_v32 = vadd.f32 %v2113_v40, %v607_v25  ;;  %v1867_v38 = vpop.f32.mrb[26].mxu1 }
 0x128   :  { %3359 = vst [vmem:[#allocation19_spill] sm:$0xff] %v2305_v20  ;;  %v1008_v48 = vadd.f32 %v1007_v28, %v1006_v11  ;;  %v482_v63 = vpop.f32.mrb[27].mxu0  ;;  %v610_v35 = vpop.f32.mrb[27].mxu1  ;;  %3362 = vst [vmem:[#allocation22_spill] sm:$0xff] %v2316_v1  ;;  %v2324_v19 = vadd.f32 %v1867_v38, %v2113_v40  ;;  %v2330_v11 = vadd.f32 %v1835_v30, %v2113_v40 }
 0x129   :  { %3360 = vst [vmem:[#allocation20_spill] sm:$0xff] %v2310_v22  ;;  %3361 = vst [vmem:[#allocation21_spill] sm:$0xff] %v2313_v32  ;;  %v1009_v2 = vsel %vm961_vm0, %v2310_v22, 0.0  ;;  %v2321_v7 = vadd.f32 %v2113_v40, %v482_v63  ;;  %v2327_v25 = vadd.f32 %v2113_v40, %v610_v35  ;;  %v1013_v22 = vsel %vm961_vm0, %v2316_v1, 0.0 }
 0x12a   :  { %3364 = vst [vmem:[#allocation24_spill] sm:$0xff] %v2324_v19  ;;  %v1010_v61 = vadd.f32 %v1009_v2, %v1008_v48  ;;  %3366 = vst [vmem:[#allocation26_spill] sm:$0xff] %v2330_v11  ;;  %v1015_v35 = vsel %vm961_vm0, %v2330_v11, 0.0 }
 0x12b   :  { %3363 = vst [vmem:[#allocation23_spill] sm:$0xff] %v2321_v7  ;;  %3365 = vst [vmem:[#allocation25_spill] sm:$0xff] %v2327_v25  ;;  %v1011_v4 = vsel %vm961_vm0, %v2321_v7, 0.0 }
 0x12c   :  { %v1012_v28 = vadd.f32 %v1011_v4, %v1010_v61 }
 0x12d   :  { %v1838_v42 = vpop.f32.mrb[28].mxu0  ;;  %v1870_v63 = vpop.f32.mrb[28].mxu1 }
 0x12e   :  { %v1014_v21 = vadd.f32 %v1013_v22, %v1012_v28  ;;  %v495_v59 = vpop.f32.mrb[29].mxu0  ;;  %v2337_v38 = vadd.f32 %v1870_v63, %v2113_v40  ;;  %v623_v48 = vpop.f32.mrb[29].mxu1  ;;  %v2348_v22 = vadd.f32 %v1838_v42, %v2113_v40 }
 0x12f   :  { %v2342_v30 = vadd.f32 %v2113_v40, %v495_v59  ;;  %v1839_v2 = vpop.f32.mrb[30].mxu0  ;;  %v2345_v61 = vadd.f32 %v2113_v40, %v623_v48  ;;  %v1871_v4 = vpop.f32.mrb[30].mxu1 }
 0x130   :  { %3367 = vst [vmem:[#allocation27_spill] sm:$0xff] %v2337_v38  ;;  %v1016_v1 = vadd.f32 %v1015_v35, %v1014_v21  ;;  %v498_v7 = vpop.f32.mrb[31].mxu0  ;;  %v626_v47 = vpop.f32.mrb[31].mxu1  ;;  %v2356_v59 = vadd.f32 %v1871_v4, %v2113_v40  ;;  %v2362_v21 = vadd.f32 %v1839_v2, %v2113_v40  ;;  %v2368_v35 = vadd.f32 %v2113_v40, %v2118_v45 }
 0x131   :  { %3368 = vst [vmem:[#allocation28_spill] sm:$0xff] %v2342_v30  ;;  %3369 = vst [vmem:[#allocation29_spill] sm:$0xff] %v2345_v61  ;;  %v1017_v28 = vsel %vm961_vm0, %v2342_v30, 0.0  ;;  %v2353_v63 = vadd.f32 %v2113_v40, %v498_v7  ;;  %v2359_v48 = vadd.f32 %v2113_v40, %v626_v47  ;;  %v1021_v7 = vsel %vm961_vm0, %v2348_v22, 0.0 }
 0x132   :  { %3371 = vst [vmem:[#allocation31_spill] sm:$0xff] %v2356_v59  ;;  %v1018_v11 = vadd.f32 %v1017_v28, %v1016_v1  ;;  %v1023_v1 = vsel %vm961_vm0, %v2362_v21, 0.0  ;;  %v1025_v47 = vsel %vm961_vm0, %v2368_v35, 0.0  ;;  %v1029_v40 = vsel %vm961_vm0, %v2116_v44, 0.0 }
 0x133   :  { %3370 = vst [vmem:[#allocation30_spill] sm:$0xff] %v2353_v63  ;;  %v1019_v42 = vsel %vm961_vm0, %v2353_v63, 0.0  ;;  %v1027_v63 = vsel %vm961_vm0, %v2133_v54, 0.0 }
 0x134   :  { %v1020_v30 = vadd.f32 %v1019_v42, %v1018_v11  ;;  %v1031_v11 = vsel %vm961_vm0, %v2124_v50, 0.0 }
 0x136   :  { %v1022_v4 = vadd.f32 %v1021_v7, %v1020_v30  ;;  %v1033_v30 = vsel %vm961_vm0, %v2153_v5, 0.0 }
 0x138   :  { %v1024_v2 = vadd.f32 %v1023_v1, %v1022_v4  ;;  %v1035_v4 = vsel %vm961_vm0, %v2167_v15, 0.0 }
 0x13a   :  { %v1026_v28 = vadd.f32 %v1025_v47, %v1024_v2  ;;  %v1037_v47 = vsel %vm961_vm0, %v2145_v0, 0.0  ;;  %v1039_v2 = vsel %vm961_vm0, %v2164_v13, 0.0 }
 0x13c   :  { %v1028_v49 = vadd.f32 %v1027_v63, %v1026_v28 }
 0x13e   :  { %v1030_v45 = vadd.f32 %v1029_v40, %v1028_v49  ;;  %v1041_v49 = vsel %vm961_vm0, %v2185_v29, 0.0 }
 0x140   :  { %v1032_v42 = vadd.f32 %v1031_v11, %v1030_v45  ;;  %v1043_v45 = vsel %vm961_vm0, %v2199_v39, 0.0 }
 0x142   :  { %v1034_v7 = vadd.f32 %v1033_v30, %v1032_v42  ;;  %v1045_v30 = vsel %vm961_vm0, %v2177_v24, 0.0 }
 0x144   :  { %v1036_v1 = vadd.f32 %v1035_v4, %v1034_v7  ;;  %v1047_v7 = vsel %vm961_vm0, %v2196_v37, 0.0  ;;  %v1049_v4 = vsel %vm961_vm0, %v2217_v62, 0.0 }
 0x146   :  { %v1038_v63 = vadd.f32 %v1037_v47, %v1036_v1 }
 0x148   :  { %v1040_v28 = vadd.f32 %v1039_v2, %v1038_v63  ;;  %v1051_v63 = vsel %vm961_vm0, %v2231_v14, 0.0 }
 0x14a   :  { %v1042_v40 = vadd.f32 %v1041_v49, %v1040_v28  ;;  %v1053_v49 = vsel %vm961_vm0, %v2209_v57, 0.0 }
 0x14c   :  { %v1044_v11 = vadd.f32 %v1043_v45, %v1042_v40  ;;  %v1055_v40 = vsel %vm961_vm0, %v2228_v9, 0.0  ;;  %v1057_v45 = vsel %vm961_vm0, %v2249_v33, 0.0 }
 0x14e   :  { %v1046_v42 = vadd.f32 %v1045_v30, %v1044_v11 }
 0x150   :  { %v1048_v1 = vadd.f32 %v1047_v7, %v1046_v42  ;;  %v1059_v42 = vsel %vm961_vm0, %v2263_v58, 0.0 }
 0x152   :  { %v1050_v47 = vadd.f32 %v1049_v4, %v1048_v1  ;;  %v1061_v4 = vsel %vm961_vm0, %v2241_v26, 0.0 }
 0x154   :  { %v1052_v2 = vadd.f32 %v1051_v63, %v1050_v47  ;;  %v1063_v47 = vsel %vm961_vm0, %v2260_v51, 0.0  ;;  %v1065_v63 = vsel %vm961_vm0, %v2281_v23, 0.0 }
 0x156   :  { %v1054_v28 = vadd.f32 %v1053_v49, %v1052_v2 }
 0x158   :  { %v1056_v11 = vadd.f32 %v1055_v40, %v1054_v28  ;;  %v1067_v28 = vsel %vm961_vm0, %v2295_v55, 0.0 }
 0x15a   :  { %v1058_v30 = vadd.f32 %v1057_v45, %v1056_v11  ;;  %v1069_v45 = vsel %vm961_vm0, %v2273_v18, 0.0 }
 0x15c   :  { %v1060_v7 = vadd.f32 %v1059_v42, %v1058_v30  ;;  %v1071_v30 = vsel %vm961_vm0, %v2292_v43, 0.0  ;;  %v1073_v42 = vsel %vm961_vm0, %v2313_v32, 0.0 }
 0x15e   :  { %v1062_v1 = vadd.f32 %v1061_v4, %v1060_v7 }
 0x160   :  { %v1064_v2 = vadd.f32 %v1063_v47, %v1062_v1  ;;  %v1075_v1 = vsel %vm961_vm0, %v2327_v25, 0.0 }
 0x162   :  { %v1066_v49 = vadd.f32 %v1065_v63, %v1064_v2  ;;  %v1077_v63 = vsel %vm961_vm0, %v2305_v20, 0.0 }
 0x164   :  { %v1068_v40 = vadd.f32 %v1067_v28, %v1066_v49  ;;  %v1079_v49 = vsel %vm961_vm0, %v2324_v19, 0.0 }
 0x166   :  { %v1070_v11 = vadd.f32 %v1069_v45, %v1068_v40  ;;  %v1081_v40 = vsel %vm961_vm0, %v2345_v61, 0.0 }
 0x168   :  { %v1072_v7 = vadd.f32 %v1071_v30, %v1070_v11  ;;  %v1083_v11 = vsel %vm961_vm0, %v2359_v48, 0.0 }
 0x16a   :  { %v1074_v4 = vadd.f32 %v1073_v42, %v1072_v7  ;;  %v1085_v42 = vsel %vm961_vm0, %v2337_v38, 0.0 }
 0x16c   :  { %v1076_v47 = vadd.f32 %v1075_v1, %v1074_v4  ;;  %v1087_v4 = vsel %vm961_vm0, %v2356_v59, 0.0 }
 0x16e   :  { %v1078_v2 = vadd.f32 %v1077_v63, %v1076_v47 }
 0x170   :  { %v1080_v28 = vadd.f32 %v1079_v49, %v1078_v2 }
 0x172   :  { %v1082_v45 = vadd.f32 %v1081_v40, %v1080_v28 }
 0x174   :  { %v1084_v30 = vadd.f32 %v1083_v11, %v1082_v45 }
 0x176   :  { %v1086_v7 = vadd.f32 %v1085_v42, %v1084_v30 }
 0x178   :  { %v1088_v1 = vadd.f32 %v1087_v4, %v1086_v7 }
 0x17a   :  { %v1089_v47 = vrot.slane %v1088_v1, 4 }
 0x17c   :  { %v1090_v63 = vadd.f32 %v1089_v47, %v1088_v1 }
 0x17e   :  { %v1091_v19 = vrot.slane %v1090_v63, 2 }
 0x180   :  { %v1092_v2 = vadd.f32 %v1091_v19, %v1090_v63 }
 0x182   :  { %v1093_v49 = vrot.slane %v1092_v2, 1 }
 0x184   :  { %v1094_v20 = vadd.f32 %v1093_v49, %v1092_v2 }
 0x186   :  { %v2438_v61 = vmul.f32 0.001953125, %v1094_v20 }
 0x188   :  { %v1096_v28 = vsub.f32 %v2121_v46, %v2438_v61  ;;  %v1097_v40 = vsub.f32 %v2130_v53, %v2438_v61  ;;  %v1098_v45 = vsub.f32 %v2127_v52, %v2438_v61  ;;  %v1099_v11 = vsub.f32 %v2138_v56, %v2438_v61 }
 0x189   :  { %v1100_v19 = vsub.f32 %v2150_v3, %v2438_v61  ;;  %v1101_v20 = vsub.f32 %v2161_v12, %v2438_v61  ;;  %v1102_v2 = vsub.f32 %v2156_v10, %v2438_v61  ;;  %v1103_v3 = vsub.f32 %v2170_v16, %v2438_v61 }
 0x18a   :  { %v1224_v30 = vmul.f32 %v1096_v28, %v1096_v28  ;;  %v1225_v42 = vmul.f32 %v1097_v40, %v1097_v40  ;;  %v1226_v7 = vmul.f32 %v1098_v45, %v1098_v45  ;;  %v1227_v4 = vmul.f32 %v1099_v11, %v1099_v11 }
 0x18b   :  { %v1228_v49 = vmul.f32 %v1100_v19, %v1100_v19  ;;  %v1229_v45 = vmul.f32 %v1101_v20, %v1101_v20  ;;  %v1104_v11 = vsub.f32 %v2182_v27, %v2438_v61  ;;  %v1105_v19 = vsub.f32 %v2193_v36, %v2438_v61 }
 0x18c   :  { %v1288_v1 = vsel %vm961_vm0, %v1224_v30, 0.0  ;;  %v1289_v47 = vsel %vm961_vm0, %v1225_v42, 0.0  ;;  %v1291_v28 = vsel %vm961_vm0, %v1226_v7, 0.0  ;;  %v1293_v56 = vsel %vm961_vm0, %v1227_v4, 0.0 }
 0x18d   :  { %v1290_v63 = vadd.f32 %v1289_v47, %v1288_v1  ;;  %v1230_v30 = vmul.f32 %v1102_v2, %v1102_v2  ;;  %v1295_v42 = vsel %vm961_vm0, %v1228_v49, 0.0  ;;  %v1231_v47 = vmul.f32 %v1103_v3, %v1103_v3 }
 0x18e   :  { %v1297_v7 = vsel %vm961_vm0, %v1229_v45, 0.0  ;;  %v1106_v20 = vsub.f32 %v2188_v34, %v2438_v61  ;;  %v1107_v2 = vsub.f32 %v2202_v41, %v2438_v61  ;;  %v1108_v3 = vsub.f32 %v2214_v60, %v2438_v61 }
 0x18f   :  { %v1292_v40 = vadd.f32 %v1291_v28, %v1290_v63  ;;  %v1232_v28 = vmul.f32 %v1104_v11, %v1104_v11  ;;  %v1109_v11 = vsub.f32 %v2225_v8, %v2438_v61 }
 0x191   :  { %v1294_v12 = vadd.f32 %v1293_v56, %v1292_v40  ;;  %v1299_v56 = vsel %vm961_vm0, %v1230_v30, 0.0  ;;  %v1233_v40 = vmul.f32 %v1105_v19, %v1105_v19  ;;  %v1303_v45 = vsel %vm961_vm0, %v1232_v28, 0.0 }
 0x192   :  { %v1110_v19 = vsub.f32 %v2220_v6, %v2438_v61 }
 0x193   :  { %v1296_v1 = vadd.f32 %v1295_v42, %v1294_v12  ;;  %v1301_v12 = vsel %vm961_vm0, %v1231_v47, 0.0  ;;  %v1234_v42 = vmul.f32 %v1106_v20, %v1106_v20  ;;  %v1305_v30 = vsel %vm961_vm0, %v1233_v40, 0.0 }
 0x194   :  { %v1111_v20 = vsub.f32 %v2234_v17, %v2438_v61 }
 0x195   :  { %v1298_v63 = vadd.f32 %v1297_v7, %v1296_v1  ;;  %v1235_v7 = vmul.f32 %v1107_v2, %v1107_v2  ;;  %v1307_v47 = vsel %vm961_vm0, %v1234_v42, 0.0  ;;  %v1112_v2 = vsub.f32 %v2246_v31, %v2438_v61 }
 0x196   :  { %v1239_v6 = vmul.f32 %v1111_v20, %v1111_v20 }
 0x197   :  { %v1300_v4 = vadd.f32 %v1299_v56, %v1298_v63  ;;  %v1236_v56 = vmul.f32 %v1108_v3, %v1108_v3  ;;  %v1309_v28 = vsel %vm961_vm0, %v1235_v7, 0.0  ;;  %v1240_v17 = vmul.f32 %v1112_v2, %v1112_v2 }
 0x199   :  { %v1302_v49 = vadd.f32 %v1301_v12, %v1300_v4  ;;  %v1237_v12 = vmul.f32 %v1109_v11, %v1109_v11  ;;  %v1311_v40 = vsel %vm961_vm0, %v1236_v56, 0.0  ;;  %v1317_v56 = vsel %vm961_vm0, %v1239_v6, 0.0 }
 0x19b   :  { %v1304_v1 = vadd.f32 %v1303_v45, %v1302_v49  ;;  %v1238_v45 = vmul.f32 %v1110_v19, %v1110_v19  ;;  %v1313_v42 = vsel %vm961_vm0, %v1237_v12, 0.0  ;;  %v1319_v12 = vsel %vm961_vm0, %v1240_v17, 0.0 }
 0x19d   :  { %v1306_v63 = vadd.f32 %v1305_v30, %v1304_v1  ;;  %v3372_v30 = vld [vmem:[#allocation12_spill] sm:$0xff]  ;;  %v1315_v7 = vsel %vm961_vm0, %v1238_v45, 0.0 }
 0x19e   :  { %v1113_v3 = vsub.f32 %v3372_v30, %v2438_v61 }
 0x19f   :  { %v1308_v4 = vadd.f32 %v1307_v47, %v1306_v63  ;;  %v3373_v47 = vld [vmem:[#allocation11_spill] sm:$0xff] }
 0x1a0   :  { %v1114_v11 = vsub.f32 %v3373_v47, %v2438_v61  ;;  %v1241_v31 = vmul.f32 %v1113_v3, %v1113_v3 }
 0x1a1   :  { %v1310_v49 = vadd.f32 %v1309_v28, %v1308_v4  ;;  %v3374_v28 = vld [vmem:[#allocation13_spill] sm:$0xff] }
 0x1a2   :  { %v1115_v19 = vsub.f32 %v3374_v28, %v2438_v61  ;;  %v1242_v30 = vmul.f32 %v1114_v11, %v1114_v11  ;;  %v1321_v45 = vsel %vm961_vm0, %v1241_v31, 0.0 }
 0x1a3   :  { %v1312_v1 = vadd.f32 %v1311_v40, %v1310_v49  ;;  %v3375_v40 = vld [vmem:[#allocation14_spill] sm:$0xff] }
 0x1a4   :  { %v1116_v20 = vsub.f32 %v3375_v40, %v2438_v61  ;;  %v1243_v47 = vmul.f32 %v1115_v19, %v1115_v19  ;;  %v1323_v6 = vsel %vm961_vm0, %v1242_v30, 0.0 }
 0x1a5   :  { %v1314_v63 = vadd.f32 %v1313_v42, %v1312_v1  ;;  %v3376_v42 = vld [vmem:[#allocation16_spill] sm:$0xff] }
 0x1a6   :  { %v1117_v2 = vsub.f32 %v3376_v42, %v2438_v61  ;;  %v1244_v28 = vmul.f32 %v1116_v20, %v1116_v20  ;;  %v1325_v17 = vsel %vm961_vm0, %v1243_v47, 0.0 }
 0x1a7   :  { %v1316_v4 = vadd.f32 %v1315_v7, %v1314_v63  ;;  %v3377_v7 = vld [vmem:[#allocation15_spill] sm:$0xff] }
 0x1a8   :  { %v1118_v3 = vsub.f32 %v3377_v7, %v2438_v61  ;;  %v1245_v40 = vmul.f32 %v1117_v2, %v1117_v2  ;;  %v1327_v31 = vsel %vm961_vm0, %v1244_v28, 0.0 }
 0x1a9   :  { %v1318_v49 = vadd.f32 %v1317_v56, %v1316_v4  ;;  %v3378_v56 = vld [vmem:[#allocation18_spill] sm:$0xff] }
 0x1aa   :  { %v1119_v11 = vsub.f32 %v3378_v56, %v2438_v61  ;;  %v1246_v42 = vmul.f32 %v1118_v3, %v1118_v3  ;;  %v1329_v30 = vsel %vm961_vm0, %v1245_v40, 0.0 }
 0x1ab   :  { %v1320_v1 = vadd.f32 %v1319_v12, %v1318_v49  ;;  %v3379_v12 = vld [vmem:[#allocation20_spill] sm:$0xff] }
 0x1ac   :  { %v1120_v19 = vsub.f32 %v3379_v12, %v2438_v61  ;;  %v1247_v7 = vmul.f32 %v1119_v11, %v1119_v11  ;;  %v1331_v47 = vsel %vm961_vm0, %v1246_v42, 0.0 }
 0x1ad   :  { %v1322_v63 = vadd.f32 %v1321_v45, %v1320_v1  ;;  %v3380_v45 = vld [vmem:[#allocation23_spill] sm:$0xff] }
 0x1ae   :  { %v1121_v20 = vsub.f32 %v3380_v45, %v2438_v61  ;;  %v1248_v56 = vmul.f32 %v1120_v19, %v1120_v19  ;;  %v1333_v28 = vsel %vm961_vm0, %v1247_v7, 0.0 }
 0x1af   :  { %v1324_v4 = vadd.f32 %v1323_v6, %v1322_v63  ;;  %v3381_v6 = vld [vmem:[#allocation22_spill] sm:$0xff] }
 0x1b0   :  { %v1122_v2 = vsub.f32 %v3381_v6, %v2438_v61  ;;  %v1249_v12 = vmul.f32 %v1121_v20, %v1121_v20  ;;  %v1335_v40 = vsel %vm961_vm0, %v1248_v56, 0.0  ;;  %v1126_v20 = vsub.f32 %v2348_v22, %v2438_v61 }
 0x1b1   :  { %v1326_v49 = vadd.f32 %v1325_v17, %v1324_v4  ;;  %v3382_v17 = vld [vmem:[#allocation26_spill] sm:$0xff] }
 0x1b2   :  { %v1123_v3 = vsub.f32 %v3382_v17, %v2438_v61  ;;  %v1250_v45 = vmul.f32 %v1122_v2, %v1122_v2  ;;  %v1337_v42 = vsel %vm961_vm0, %v1249_v12, 0.0  ;;  %v1127_v2 = vsub.f32 %v2362_v21, %v2438_v61 }
 0x1b3   :  { %v1328_v1 = vadd.f32 %v1327_v31, %v1326_v49  ;;  %v3383_v31 = vld [vmem:[#allocation28_spill] sm:$0xff] }
 0x1b4   :  { %v1124_v11 = vsub.f32 %v3383_v31, %v2438_v61  ;;  %v1251_v6 = vmul.f32 %v1123_v3, %v1123_v3  ;;  %v1339_v7 = vsel %vm961_vm0, %v1250_v45, 0.0  ;;  %v1128_v3 = vsub.f32 %v2368_v35, %v2438_v61 }
 0x1b5   :  { %v1330_v63 = vadd.f32 %v1329_v30, %v1328_v1  ;;  %v3384_v30 = vld [vmem:[#allocation30_spill] sm:$0xff] }
 0x1b6   :  { %v1125_v19 = vsub.f32 %v3384_v30, %v2438_v61  ;;  %v1341_v56 = vsel %vm961_vm0, %v1251_v6, 0.0 }
 0x1b7   :  { %v1332_v4 = vadd.f32 %v1331_v47, %v1330_v63  ;;  %v1252_v47 = vmul.f32 %v1124_v11, %v1124_v11  ;;  %v1129_v11 = vsub.f32 %v2133_v54, %v2438_v61 }
 0x1b9   :  { %v1334_v49 = vadd.f32 %v1333_v28, %v1332_v4  ;;  %v1253_v28 = vmul.f32 %v1125_v19, %v1125_v19  ;;  %v1343_v12 = vsel %vm961_vm0, %v1252_v47, 0.0  ;;  %v1130_v19 = vsub.f32 %v2116_v44, %v2438_v61 }
 0x1bb   :  { %v1336_v1 = vadd.f32 %v1335_v40, %v1334_v49  ;;  %v1254_v40 = vmul.f32 %v1126_v20, %v1126_v20  ;;  %v1345_v45 = vsel %vm961_vm0, %v1253_v28, 0.0  ;;  %v1131_v20 = vsub.f32 %v2124_v50, %v2438_v61 }
 0x1bd   :  { %v1338_v63 = vadd.f32 %v1337_v42, %v1336_v1  ;;  %v1255_v42 = vmul.f32 %v1127_v2, %v1127_v2  ;;  %v1347_v6 = vsel %vm961_vm0, %v1254_v40, 0.0  ;;  %v1132_v2 = vsub.f32 %v2153_v5, %v2438_v61 }
 0x1bf   :  { %v1340_v4 = vadd.f32 %v1339_v7, %v1338_v63  ;;  %v1256_v7 = vmul.f32 %v1128_v3, %v1128_v3  ;;  %v1349_v47 = vsel %vm961_vm0, %v1255_v42, 0.0  ;;  %v1133_v3 = vsub.f32 %v2167_v15, %v2438_v61 }
 0x1c1   :  { %v1342_v49 = vadd.f32 %v1341_v56, %v1340_v4  ;;  %v1257_v56 = vmul.f32 %v1129_v11, %v1129_v11  ;;  %v1351_v28 = vsel %vm961_vm0, %v1256_v7, 0.0  ;;  %v1134_v11 = vsub.f32 %v2145_v0, %v2438_v61 }
 0x1c3   :  { %v1344_v1 = vadd.f32 %v1343_v12, %v1342_v49  ;;  %v1258_v12 = vmul.f32 %v1130_v19, %v1130_v19  ;;  %v1353_v40 = vsel %vm961_vm0, %v1257_v56, 0.0  ;;  %v1135_v19 = vsub.f32 %v2164_v13, %v2438_v61 }
 0x1c5   :  { %v1346_v63 = vadd.f32 %v1345_v45, %v1344_v1  ;;  %v1259_v45 = vmul.f32 %v1131_v20, %v1131_v20  ;;  %v1355_v42 = vsel %vm961_vm0, %v1258_v12, 0.0  ;;  %v1136_v20 = vsub.f32 %v2185_v29, %v2438_v61 }
 0x1c7   :  { %v1348_v4 = vadd.f32 %v1347_v6, %v1346_v63  ;;  %v1260_v6 = vmul.f32 %v1132_v2, %v1132_v2  ;;  %v1357_v7 = vsel %vm961_vm0, %v1259_v45, 0.0  ;;  %v1137_v2 = vsub.f32 %v2199_v39, %v2438_v61 }
 0x1c9   :  { %v1350_v49 = vadd.f32 %v1349_v47, %v1348_v4  ;;  %v1261_v47 = vmul.f32 %v1133_v3, %v1133_v3  ;;  %v1359_v56 = vsel %vm961_vm0, %v1260_v6, 0.0  ;;  %v1138_v3 = vsub.f32 %v2177_v24, %v2438_v61 }
 0x1cb   :  { %v1352_v1 = vadd.f32 %v1351_v28, %v1350_v49  ;;  %v1262_v28 = vmul.f32 %v1134_v11, %v1134_v11  ;;  %v1361_v12 = vsel %vm961_vm0, %v1261_v47, 0.0  ;;  %v1139_v11 = vsub.f32 %v2196_v37, %v2438_v61 }
 0x1cd   :  { %v1354_v63 = vadd.f32 %v1353_v40, %v1352_v1  ;;  %v1263_v40 = vmul.f32 %v1135_v19, %v1135_v19  ;;  %v1363_v45 = vsel %vm961_vm0, %v1262_v28, 0.0  ;;  %v1140_v19 = vsub.f32 %v2217_v62, %v2438_v61 }
 0x1cf   :  { %v1356_v4 = vadd.f32 %v1355_v42, %v1354_v63  ;;  %v1264_v42 = vmul.f32 %v1136_v20, %v1136_v20  ;;  %v1365_v6 = vsel %vm961_vm0, %v1263_v40, 0.0  ;;  %v1141_v20 = vsub.f32 %v2231_v14, %v2438_v61 }
 0x1d1   :  { %v1358_v49 = vadd.f32 %v1357_v7, %v1356_v4  ;;  %v1265_v7 = vmul.f32 %v1137_v2, %v1137_v2  ;;  %v1367_v47 = vsel %vm961_vm0, %v1264_v42, 0.0  ;;  %v1142_v2 = vsub.f32 %v2209_v57, %v2438_v61 }
 0x1d3   :  { %v1360_v1 = vadd.f32 %v1359_v56, %v1358_v49  ;;  %v1266_v56 = vmul.f32 %v1138_v3, %v1138_v3  ;;  %v1369_v28 = vsel %vm961_vm0, %v1265_v7, 0.0  ;;  %v1143_v3 = vsub.f32 %v2228_v9, %v2438_v61 }
 0x1d5   :  { %v1362_v63 = vadd.f32 %v1361_v12, %v1360_v1  ;;  %v1267_v12 = vmul.f32 %v1139_v11, %v1139_v11  ;;  %v1371_v40 = vsel %vm961_vm0, %v1266_v56, 0.0  ;;  %v1144_v11 = vsub.f32 %v2249_v33, %v2438_v61 }
 0x1d7   :  { %v1364_v4 = vadd.f32 %v1363_v45, %v1362_v63  ;;  %v1268_v45 = vmul.f32 %v1140_v19, %v1140_v19  ;;  %v1373_v42 = vsel %vm961_vm0, %v1267_v12, 0.0  ;;  %v1145_v19 = vsub.f32 %v2263_v58, %v2438_v61 }
 0x1d9   :  { %v1366_v49 = vadd.f32 %v1365_v6, %v1364_v4  ;;  %v1269_v6 = vmul.f32 %v1141_v20, %v1141_v20  ;;  %v1375_v7 = vsel %vm961_vm0, %v1268_v45, 0.0  ;;  %v1146_v20 = vsub.f32 %v2241_v26, %v2438_v61 }
 0x1db   :  { %v1368_v1 = vadd.f32 %v1367_v47, %v1366_v49  ;;  %v1270_v47 = vmul.f32 %v1142_v2, %v1142_v2  ;;  %v1377_v56 = vsel %vm961_vm0, %v1269_v6, 0.0  ;;  %v1147_v2 = vsub.f32 %v2260_v51, %v2438_v61 }
 0x1dd   :  { %v1370_v63 = vadd.f32 %v1369_v28, %v1368_v1  ;;  %v1271_v28 = vmul.f32 %v1143_v3, %v1143_v3  ;;  %v1379_v12 = vsel %vm961_vm0, %v1270_v47, 0.0  ;;  %v1148_v3 = vsub.f32 %v2281_v23, %v2438_v61 }
 0x1df   :  { %v1372_v4 = vadd.f32 %v1371_v40, %v1370_v63  ;;  %v1272_v40 = vmul.f32 %v1144_v11, %v1144_v11  ;;  %v1381_v45 = vsel %vm961_vm0, %v1271_v28, 0.0  ;;  %v1149_v11 = vsub.f32 %v2295_v55, %v2438_v61 }
 0x1e1   :  { %v1374_v49 = vadd.f32 %v1373_v42, %v1372_v4  ;;  %v1273_v42 = vmul.f32 %v1145_v19, %v1145_v19  ;;  %v1383_v6 = vsel %vm961_vm0, %v1272_v40, 0.0  ;;  %v1150_v19 = vsub.f32 %v2273_v18, %v2438_v61 }
 0x1e3   :  { %v1376_v1 = vadd.f32 %v1375_v7, %v1374_v49  ;;  %v1274_v7 = vmul.f32 %v1146_v20, %v1146_v20  ;;  %v1385_v47 = vsel %vm961_vm0, %v1273_v42, 0.0  ;;  %v1151_v20 = vsub.f32 %v2292_v43, %v2438_v61 }
 0x1e5   :  { %v1378_v63 = vadd.f32 %v1377_v56, %v1376_v1  ;;  %v1275_v56 = vmul.f32 %v1147_v2, %v1147_v2  ;;  %v1387_v28 = vsel %vm961_vm0, %v1274_v7, 0.0  ;;  %v1152_v2 = vsub.f32 %v2313_v32, %v2438_v61 }
 0x1e7   :  { %v1380_v4 = vadd.f32 %v1379_v12, %v1378_v63  ;;  %v1276_v12 = vmul.f32 %v1148_v3, %v1148_v3  ;;  %v1389_v40 = vsel %vm961_vm0, %v1275_v56, 0.0  ;;  %v1153_v3 = vsub.f32 %v2327_v25, %v2438_v61 }
 0x1e8   :  { %v1280_v43 = vmul.f32 %v1152_v2, %v1152_v2  ;;  %v1157_v2 = vsub.f32 %v2359_v48, %v2438_v61 }
 0x1e9   :  { %v1382_v49 = vadd.f32 %v1381_v45, %v1380_v4  ;;  %v1277_v45 = vmul.f32 %v1149_v11, %v1149_v11  ;;  %v1391_v42 = vsel %vm961_vm0, %v1276_v12, 0.0  ;;  %v1281_v32 = vmul.f32 %v1153_v3, %v1153_v3 }
 0x1ea   :  { %v1158_v3 = vsub.f32 %v2337_v38, %v2438_v61 }
 0x1eb   :  { %v1384_v1 = vadd.f32 %v1383_v6, %v1382_v49  ;;  %v1278_v6 = vmul.f32 %v1150_v19, %v1150_v19  ;;  %v1393_v7 = vsel %vm961_vm0, %v1277_v45, 0.0  ;;  %v1399_v45 = vsel %vm961_vm0, %v1280_v43, 0.0 }
 0x1ed   :  { %v1386_v63 = vadd.f32 %v1385_v47, %v1384_v1  ;;  %v1279_v47 = vmul.f32 %v1151_v20, %v1151_v20  ;;  %v1395_v56 = vsel %vm961_vm0, %v1278_v6, 0.0  ;;  %v1401_v6 = vsel %vm961_vm0, %v1281_v32, 0.0 }
 0x1ef   :  { %v1388_v4 = vadd.f32 %v1387_v28, %v1386_v63  ;;  %v3385_v28 = vld [vmem:[#allocation19_spill] sm:$0xff]  ;;  %v1397_v12 = vsel %vm961_vm0, %v1279_v47, 0.0 }
 0x1f0   :  { %v1154_v11 = vsub.f32 %v3385_v28, %v2438_v61 }
 0x1f1   :  { %v1390_v49 = vadd.f32 %v1389_v40, %v1388_v4  ;;  %v3386_v40 = vld [vmem:[#allocation24_spill] sm:$0xff] }
 0x1f2   :  { %v1155_v19 = vsub.f32 %v3386_v40, %v2438_v61  ;;  %v1282_v25 = vmul.f32 %v1154_v11, %v1154_v11  ;;  %v1159_v11 = vsub.f32 %v2356_v59, %v2438_v61 }
 0x1f3   :  { %v1392_v1 = vadd.f32 %v1391_v42, %v1390_v49  ;;  %v3387_v42 = vld [vmem:[#allocation29_spill] sm:$0xff] }
 0x1f4   :  { %v1156_v20 = vsub.f32 %v3387_v42, %v2438_v61  ;;  %v1403_v47 = vsel %vm961_vm0, %v1282_v25, 0.0  ;;  %v1287_v32 = vmul.f32 %v1159_v11, %v1159_v11 }
 0x1f5   :  { %v1394_v63 = vadd.f32 %v1393_v7, %v1392_v1  ;;  %v1283_v7 = vmul.f32 %v1155_v19, %v1155_v19 }
 0x1f6   :  { %v1413_v25 = vsel %vm961_vm0, %v1287_v32, 0.0 }
 0x1f7   :  { %v1396_v4 = vadd.f32 %v1395_v56, %v1394_v63  ;;  %v1284_v56 = vmul.f32 %v1156_v20, %v1156_v20  ;;  %v1405_v43 = vsel %vm961_vm0, %v1283_v7, 0.0 }
 0x1f9   :  { %v1398_v49 = vadd.f32 %v1397_v12, %v1396_v4  ;;  %v1285_v12 = vmul.f32 %v1157_v2, %v1157_v2  ;;  %v1407_v19 = vsel %vm961_vm0, %v1284_v56, 0.0  ;;  %v1428_v56 = vlaneseq }
 0x1fb   :  { %v1400_v1 = vadd.f32 %v1399_v45, %v1398_v49  ;;  %v1286_v45 = vmul.f32 %v1158_v3, %v1158_v3  ;;  %v1429_v11 = vshrl.u32 %v1428_v56, 7 }
 0x1fd   :  { %v1402_v63 = vadd.f32 %v1401_v6, %v1400_v1  ;;  %v1409_v1 = vsel %vm961_vm0, %v1285_v12, 0.0  ;;  %v1411_v20 = vsel %vm961_vm0, %v1286_v45, 0.0  ;;  %v1430_v12 = vsub.s32 0, %v1429_v11 }
 0x1ff   :  { %v1404_v4 = vadd.f32 %v1403_v47, %v1402_v63 }
 0x201   :  { %v1406_v49 = vadd.f32 %v1405_v43, %v1404_v4 }
 0x203   :  { %v1408_v42 = vadd.f32 %v1407_v19, %v1406_v49 }
 0x205   :  { %v1410_v6 = vadd.f32 %v1409_v1, %v1408_v42  ;;  %v638_v42 = vld [vmem:[%s3299_s3] sm:$0x1]  ;;  %s1957_s3 = smov [#allocation2]  }
 0x207   :  { %v1412_v38 = vadd.f32 %v1411_v20, %v1410_v6 }
 0x209   :  { %v1414_v63 = vadd.f32 %v1413_v25, %v1412_v38  ;;  %v639_v38 = vld [vmem:[%s3300_s4] sm:$0x1]  ;;  %s1700_s4 = sshll.u32 %s1957_s3, 4  ;;  %s3265_s4 = int_to_ptr.vmem [resolvable:$true] %s1700_s4 }
 0x20a   :  { %v3388_v25 = vld [vmem:[#allocation5_spill] sm:$0xff]  ;;  %s1933_s24 = scalar_lea.vmem %s3265_s4, 8192  ;;  %p1938_p1 = scmp.lt.s32.totalorder %s3265_s4, %s3265_s4 }
 0x20b   :  { %v1415_v47 = vrot.slane %v1414_v63, 4  ;;  %p1934_p0 = scmp.ne.s32.totalorder %s3265_s4, %s1933_s24  ;;  %p1939_p2 = scmp.lt.s32.totalorder %s1933_s24, %s1933_s24 }
 0x20d   :  { %v1416_v59 = vadd.f32 %v1415_v47, %v1414_v63  ;;  %v3389_v63 = vld [vmem:[#allocation6_spill] sm:$0xff]  ;;  %p1940_p3 = por %p1939_p2, %p1938_p1 }
 0x20f   :  { %v1417_v2 = vrot.slane %v1416_v59, 2  ;;  %p1941_p4 = pnand %p1940_p3, %p1934_p0 }
 0x211   :  { %v1418_v40 = vadd.f32 %v1417_v2, %v1416_v59 }
 0x213   :  { %v1419_v7 = vrot.slane %v1418_v40, 1 }
 0x215   :  { %v1420_v4 = vadd.f32 %v1419_v7, %v1418_v40 }
 0x217   :  { %v1421_v3 = vmul.f32 0.001953125, %v1420_v4 }
 0x219   :  { %v1422_v43 = vadd.f32 1e-05, %v1421_v3 }
 0x21b   :  { %1931 = vrsqrt.f32 %v1422_v43 }
 0x225   :  { %v1932_v49 = vpop.eup %1931 }
 0x226   :  { %v1424_v45 = vmul.f32 %v1932_v49, %v638_v42  ;;  %v3395_v49 = vld [vmem:[#allocation11_spill] sm:$0xff] }
 0x228   :  { %v1425_v59 = vmul.f32 %v1424_v45, %v2438_v61  ;;  %v2639_v19 = vrot.slane %v1424_v45, %v1430_v12  ;;  %v3396_v45 = vld [vmem:[#allocation13_spill] sm:$0xff] }
 0x22a   :  { %v1426_v40 = vsub.f32 %v639_v38, %v1425_v59  ;;  %v1494_v32 = vmul.f32 %v2639_v19, %v2359_v48  ;;  %v2645_v1 = vmul.f32 %v2639_v19, %v2121_v46  ;;  %v2649_v6 = vmul.f32 %v2639_v19, %v2130_v53  ;;  %v3390_v48 = vld [vmem:[#allocation7_spill] sm:$0xff] }
 0x22b   :  { %v2653_v20 = vmul.f32 %v2639_v19, %v2127_v52  ;;  %v2657_v61 = vmul.f32 %v2639_v19, %v3388_v25  ;;  %v2661_v47 = vmul.f32 %v2639_v19, %v3389_v63  ;;  %v2665_v46 = vmul.f32 %v2639_v19, %v3390_v48  ;;  %v3398_v25 = vld [vmem:[#allocation16_spill] sm:$0xff]  ;;  %v3399_v48 = vld [vmem:[#allocation15_spill] sm:$0xff] }
 0x22c   :  { %v2667_v2 = vrot.slane %v1426_v40, %v1430_v12  ;;  %v2671_v53 = vmul.f32 %v2639_v19, %v2156_v10  ;;  %v2675_v52 = vmul.f32 %v2639_v19, %v2170_v16  ;;  %v2679_v7 = vmul.f32 %v2639_v19, %v2182_v27  ;;  %v3397_v40 = vld [vmem:[#allocation14_spill] sm:$0xff] }
 0x22d   :  { %v2683_v4 = vmul.f32 %v2639_v19, %v2193_v36  ;;  %v2687_v3 = vmul.f32 %v2639_v19, %v2188_v34  ;;  %v2691_v10 = vmul.f32 %v2639_v19, %v2202_v41  ;;  %v2695_v16 = vmul.f32 %v2639_v19, %v2214_v60  ;;  %v3391_v36 = vld [vmem:[#allocation8_spill] sm:$0xff]  ;;  %v3392_v34 = vld [vmem:[#allocation9_spill] sm:$0xff]  ;;  %v3393_v41 = vld [vmem:[#allocation10_spill] sm:$0xff] }
 0x22e   :  { %v1564_v43 = vadd.f32 %v2667_v2, %v1494_v32  ;;  %v2700_v27 = vmul.f32 %v2639_v19, %v2225_v8  ;;  %v2704_v56 = vmul.f32 %v2639_v19, %v3391_v36  ;;  %v2708_v11 = vmul.f32 %v2639_v19, %v3392_v34  ;;  %v3394_v60 = vld [vmem:[#allocation12_spill] sm:$0xff]  ;;  %v3400_v34 = vld [vmem:[#allocation18_spill] sm:$0xff] }
 0x22f   :  { %v2712_v42 = vmul.f32 %v2639_v19, %v3393_v41  ;;  %v2716_v12 = vmul.f32 %v2639_v19, %v3394_v60  ;;  %v2720_v8 = vmul.f32 %v2639_v19, %v3395_v49  ;;  %v2724_v38 = vmul.f32 %v2639_v19, %v3396_v45  ;;  %v3401_v60 = vld [vmem:[#allocation20_spill] sm:$0xff] }
 0x230   :  { %v1628_v59 = vmax.f32 %v1564_v43, 0.0  ;;  %v2728_v32 = vmul.f32 %v2639_v19, %v3397_v40  ;;  %v2732_v63 = vmul.f32 %v2639_v19, %v3398_v25  ;;  %v2736_v36 = vmul.f32 %v2639_v19, %v3399_v48  ;;  %v3402_v43 = vld [vmem:[#allocation23_spill] sm:$0xff]  ;;  %v3403_v40 = vld [vmem:[#allocation22_spill] sm:$0xff] }
 0x231   :  { %v2740_v41 = vmul.f32 %v2639_v19, %v3400_v34  ;;  %v2744_v49 = vmul.f32 %v2639_v19, %v3401_v60  ;;  %v2748_v45 = vmul.f32 %v2639_v19, %v3402_v43  ;;  %v2752_v25 = vmul.f32 %v2639_v19, %v3403_v40 }
 0x232   :  { %1692 = vst.msk [vmem:[#allocation2 + $0x1e8] sm:$0xff] %vm961_vm0, %v1628_v59  ;;  %v2757_v48 = vmul.f32 %v2639_v19, %v3382_v17  ;;  %v2761_v34 = vmul.f32 %v2639_v19, %v3383_v31  ;;  %v2765_v60 = vmul.f32 %v2639_v19, %v3384_v30  ;;  %v2769_v43 = vmul.f32 %v2639_v19, %v2348_v22  ;;  %v3408_v59 = vld [vmem:[#allocation17_spill] sm:$0xff] }
 0x233   :  { %v2773_v40 = vmul.f32 %v2639_v19, %v2362_v21  ;;  %v2777_v17 = vmul.f32 %v2639_v19, %v2368_v35  ;;  %v2781_v31 = vmul.f32 %v2639_v19, %v2133_v54  ;;  %v2785_v30 = vmul.f32 %v2639_v19, %v2116_v44 }
 0x234   :  { %v2789_v22 = vmul.f32 %v2639_v19, %v2124_v50  ;;  %v2793_v21 = vmul.f32 %v2639_v19, %v2153_v5  ;;  %v2797_v35 = vmul.f32 %v2639_v19, %v2167_v15  ;;  %v2801_v54 = vmul.f32 %v2639_v19, %v2145_v0 }
 0x235   :  { %v2805_v44 = vmul.f32 %v2639_v19, %v2164_v13  ;;  %v2809_v50 = vmul.f32 %v2639_v19, %v2185_v29  ;;  %v2813_v5 = vmul.f32 %v2639_v19, %v2199_v39  ;;  %v2817_v15 = vmul.f32 %v2639_v19, %v2177_v24 }
 0x236   :  { %v2821_v0 = vmul.f32 %v2639_v19, %v2196_v37  ;;  %v2825_v13 = vmul.f32 %v2639_v19, %v2217_v62  ;;  %v2829_v29 = vmul.f32 %v2639_v19, %v2231_v14  ;;  %v2833_v39 = vmul.f32 %v2639_v19, %v2209_v57 }
 0x237   :  { %v2837_v24 = vmul.f32 %v2639_v19, %v2228_v9  ;;  %v2841_v37 = vmul.f32 %v2639_v19, %v2249_v33  ;;  %v2845_v62 = vmul.f32 %v2639_v19, %v2263_v58  ;;  %v2849_v14 = vmul.f32 %v2639_v19, %v2241_v26 }
 0x238   :  { %v2853_v57 = vmul.f32 %v2639_v19, %v2260_v51  ;;  %v2857_v9 = vmul.f32 %v2639_v19, %v2281_v23  ;;  %v2861_v33 = vmul.f32 %v2639_v19, %v2295_v55  ;;  %v2865_v58 = vmul.f32 %v2639_v19, %v2273_v18 }
 0x239   :  { %3404 = vst [vmem:[#allocation26_spill] sm:$0xff] %v2849_v14  ;;  %v2869_v26 = vmul.f32 %v2639_v19, %v3408_v59  ;;  %v3410_v14 = vld [vmem:[#allocation21_spill] sm:$0xff]  ;;  %v2881_v55 = vmul.f32 %v2639_v19, %v3385_v28  ;;  %v2901_v28 = vadd.f32 %v2667_v2, %v2645_v1  ;;  %v2921_v1 = vadd.f32 %v2667_v2, %v2665_v46 }
 0x23a   :  { %3405 = vst [vmem:[#allocation28_spill] sm:$0xff] %v2853_v57  ;;  %3406 = vst [vmem:[#allocation30_spill] sm:$0xff] %v2861_v33  ;;  %v2873_v51 = vmul.f32 %v2639_v19, %v3410_v14  ;;  %v3412_v57 = vld [vmem:[#allocation25_spill] sm:$0xff]  ;;  %v3413_v33 = vld [vmem:[#allocation24_spill] sm:$0xff]  ;;  %v2941_v46 = vadd.f32 %v2667_v2, %v2687_v3  ;;  %v2961_v3 = vadd.f32 %v2667_v2, %v2708_v11 }
 0x23b   :  { %3407 = vst [vmem:[#allocation19_spill] sm:$0xff] %v2865_v58  ;;  %3409 = vst [vmem:[#allocation5_spill] sm:$0xff] %v2869_v26  ;;  %v2877_v23 = vmul.f32 %v2639_v19, %v3412_v57  ;;  %v2885_v18 = vmul.f32 %v2639_v19, %v3413_v33  ;;  %v3414_v58 = vld [vmem:[#allocation29_spill] sm:$0xff]  ;;  %v3415_v26 = vld [vmem:[#allocation27_spill] sm:$0xff]  ;;  %v2905_v33 = vadd.f32 %v2667_v2, %v2649_v6 }
 0x23c   :  { %3411 = vst [vmem:[#allocation6_spill] sm:$0xff] %v2873_v51  ;;  %v2889_v59 = vmul.f32 %v2639_v19, %v3414_v58  ;;  %v2893_v14 = vmul.f32 %v2639_v19, %v3415_v26  ;;  %v3416_v51 = vld [vmem:[#allocation31_spill] sm:$0xff]  ;;  %v2909_v58 = vadd.f32 %v2667_v2, %v2653_v20  ;;  %v2913_v26 = vadd.f32 %v2667_v2, %v2657_v61 }
 0x23d   :  { %v2897_v57 = vmul.f32 %v2639_v19, %v3416_v51  ;;  %v2917_v19 = vadd.f32 %v2667_v2, %v2661_v47  ;;  %v2925_v6 = vadd.f32 %v2667_v2, %v2671_v53  ;;  %v2929_v20 = vadd.f32 %v2667_v2, %v2675_v52 }
 0x23e   :  { %v2933_v61 = vadd.f32 %v2667_v2, %v2679_v7  ;;  %v2937_v47 = vadd.f32 %v2667_v2, %v2683_v4  ;;  %v2945_v53 = vadd.f32 %v2667_v2, %v2691_v10  ;;  %v2949_v52 = vadd.f32 %v2667_v2, %v2695_v16 }
 0x23f   :  { %v2953_v7 = vadd.f32 %v2667_v2, %v2700_v27  ;;  %v2957_v4 = vadd.f32 %v2667_v2, %v2704_v56  ;;  %v2965_v10 = vadd.f32 %v2667_v2, %v2712_v42  ;;  %v2969_v16 = vadd.f32 %v2667_v2, %v2716_v12 }
 0x240   :  { %v2973_v27 = vadd.f32 %v2667_v2, %v2720_v8  ;;  %v2977_v56 = vadd.f32 %v2667_v2, %v2724_v38  ;;  %v2981_v11 = vadd.f32 %v2667_v2, %v2728_v32  ;;  %v2985_v42 = vadd.f32 %v2667_v2, %v2732_v63  ;;  %v3421_v51 = vld [vmem:[#allocation26_spill] sm:$0xff] }
 0x241   :  { %v2989_v12 = vadd.f32 %v2667_v2, %v2736_v36  ;;  %v2993_v8 = vadd.f32 %v2667_v2, %v2740_v41  ;;  %v2997_v38 = vadd.f32 %v2667_v2, %v2744_v49  ;;  %v3001_v32 = vadd.f32 %v2667_v2, %v2748_v45 }
 0x242   :  { %v3005_v63 = vadd.f32 %v2667_v2, %v2752_v25  ;;  %v3009_v36 = vadd.f32 %v2667_v2, %v2757_v48  ;;  %v3013_v41 = vadd.f32 %v2667_v2, %v2761_v34  ;;  %v3017_v49 = vadd.f32 %v2667_v2, %v2765_v60 }
 0x243   :  { %v3021_v45 = vadd.f32 %v2667_v2, %v2769_v43  ;;  %v3025_v25 = vadd.f32 %v2667_v2, %v2773_v40  ;;  %v3029_v48 = vadd.f32 %v2667_v2, %v2777_v17  ;;  %v3033_v34 = vadd.f32 %v2667_v2, %v2781_v31 }
 0x244   :  { %v3037_v60 = vadd.f32 %v2667_v2, %v2785_v30  ;;  %v3041_v43 = vadd.f32 %v2667_v2, %v2789_v22  ;;  %v3045_v40 = vadd.f32 %v2667_v2, %v2793_v21  ;;  %v3049_v17 = vadd.f32 %v2667_v2, %v2797_v35 }
 0x245   :  { %v3053_v31 = vadd.f32 %v2667_v2, %v2801_v54  ;;  %v3057_v30 = vadd.f32 %v2667_v2, %v2805_v44  ;;  %v3061_v22 = vadd.f32 %v2667_v2, %v2809_v50  ;;  %v3065_v21 = vadd.f32 %v2667_v2, %v2813_v5 }
 0x246   :  { %v3069_v35 = vadd.f32 %v2667_v2, %v2817_v15  ;;  %v3073_v54 = vadd.f32 %v2667_v2, %v2821_v0  ;;  %v3077_v44 = vadd.f32 %v2667_v2, %v2825_v13  ;;  %v3081_v50 = vadd.f32 %v2667_v2, %v2829_v29 }
 0x247   :  { %v3085_v5 = vadd.f32 %v2667_v2, %v2833_v39  ;;  %v3089_v15 = vadd.f32 %v2667_v2, %v2837_v24  ;;  %v3093_v0 = vadd.f32 %v2667_v2, %v2841_v37  ;;  %v3097_v13 = vadd.f32 %v2667_v2, %v2845_v62 }
 0x248   :  { %3417 = vst [vmem:[#allocation7_spill] sm:$0xff] %v3081_v50  ;;  %v3101_v29 = vadd.f32 %v2667_v2, %v3421_v51  ;;  %v3423_v50 = vld [vmem:[#allocation28_spill] sm:$0xff]  ;;  %v3109_v24 = vadd.f32 %v2667_v2, %v2857_v9  ;;  %v3129_v9 = vadd.f32 %v2667_v2, %v2877_v23  ;;  %v3149_v23 = vadd.f32 %v2667_v2, %v2897_v57 }
 0x249   :  { %3418 = vst [vmem:[#allocation8_spill] sm:$0xff] %v3089_v15  ;;  %3419 = vst [vmem:[#allocation9_spill] sm:$0xff] %v3093_v0  ;;  %v3105_v39 = vadd.f32 %v2667_v2, %v3423_v50  ;;  %v3424_v15 = vld [vmem:[#allocation30_spill] sm:$0xff]  ;;  %v3425_v0 = vld [vmem:[#allocation19_spill] sm:$0xff]  ;;  %v1577_v57 = vmax.f32 %v2941_v46, 0.0  ;;  %v1588_v46 = vmax.f32 %v2985_v42, 0.0 }
 0x24a   :  { %3420 = vst [vmem:[#allocation10_spill] sm:$0xff] %v3097_v13  ;;  %3422 = vst [vmem:[#allocation12_spill] sm:$0xff] %v3101_v29  ;;  %v3113_v37 = vadd.f32 %v2667_v2, %v3424_v15  ;;  %v3117_v62 = vadd.f32 %v2667_v2, %v3425_v0  ;;  %v3426_v13 = vld [vmem:[#allocation5_spill] sm:$0xff]  ;;  %v3427_v29 = vld [vmem:[#allocation6_spill] sm:$0xff]  ;;  %v3133_v15 = vadd.f32 %v2667_v2, %v2881_v55  ;;  %v1568_v55 = vmax.f32 %v2905_v33, 0.0 }
 0x24b   :  { %v3121_v51 = vadd.f32 %v2667_v2, %v3426_v13  ;;  %v3125_v50 = vadd.f32 %v2667_v2, %v3427_v29  ;;  %3428 = vst [vmem:[#allocation11_spill] sm:$0xff] %v3129_v9  ;;  %v3137_v0 = vadd.f32 %v2667_v2, %v2885_v18  ;;  %v3141_v13 = vadd.f32 %v2667_v2, %v2889_v59 }
 0x24c   :  { %3429 = vst [vmem:[#allocation13_spill] sm:$0xff] %v3133_v15  ;;  %v3145_v29 = vadd.f32 %v2667_v2, %v2893_v14  ;;  %v1567_v9 = vmax.f32 %v2901_v28, 0.0  ;;  %v1569_v15 = vmax.f32 %v2909_v58, 0.0  ;;  %v1570_v18 = vmax.f32 %v2913_v26, 0.0  ;;  %1632 = vst.msk [vmem:[#allocation2 + $0x8] sm:$0xff] %vm961_vm0, %v1568_v55 }
 0x24d   :  { %3430 = vst [vmem:[#allocation14_spill] sm:$0xff] %v3137_v0  ;;  %3431 = vst [vmem:[#allocation16_spill] sm:$0xff] %v3141_v13  ;;  %v1571_v0 = vmax.f32 %v2917_v19, 0.0  ;;  %v1572_v59 = vmax.f32 %v2921_v1, 0.0  ;;  %v1573_v13 = vmax.f32 %v2925_v6, 0.0  ;;  %v1574_v14 = vmax.f32 %v2929_v20, 0.0 }
 0x24e   :  { %3432 = vst [vmem:[#allocation15_spill] sm:$0xff] %v3145_v29  ;;  %v1575_v29 = vmax.f32 %v2933_v61, 0.0  ;;  %1631 = vst.msk [vmem:[#allocation2] sm:$0xff] %vm961_vm0, %v1567_v9  ;;  %v1576_v2 = vmax.f32 %v2937_v47, 0.0  ;;  %v1578_v28 = vmax.f32 %v2945_v53, 0.0  ;;  %v1579_v33 = vmax.f32 %v2949_v52, 0.0 }
 0x24f   :  { %1633 = vst.msk [vmem:[#allocation2 + $0x10] sm:$0xff] %vm961_vm0, %v1569_v15  ;;  %1634 = vst.msk [vmem:[#allocation2 + $0x18] sm:$0xff] %vm961_vm0, %v1570_v18  ;;  %v1580_v58 = vmax.f32 %v2953_v7, 0.0  ;;  %v1581_v26 = vmax.f32 %v2957_v4, 0.0  ;;  %v1582_v19 = vmax.f32 %v2961_v3, 0.0  ;;  %v1583_v1 = vmax.f32 %v2965_v10, 0.0 }
 0x250   :  { %1635 = vst.msk [vmem:[#allocation2 + $0x20] sm:$0xff] %vm961_vm0, %v1571_v0  ;;  %1636 = vst.msk [vmem:[#allocation2 + $0x28] sm:$0xff] %vm961_vm0, %v1572_v59  ;;  %v1584_v6 = vmax.f32 %v2969_v16, 0.0  ;;  %v1585_v20 = vmax.f32 %v2973_v27, 0.0  ;;  %v1586_v61 = vmax.f32 %v2977_v56, 0.0  ;;  %v1587_v47 = vmax.f32 %v2981_v11, 0.0 }
 0x251   :  { %1637 = vst.msk [vmem:[#allocation2 + $0x30] sm:$0xff] %vm961_vm0, %v1573_v13  ;;  %1638 = vst.msk [vmem:[#allocation2 + $0x38] sm:$0xff] %vm961_vm0, %v1574_v14  ;;  %v1589_v53 = vmax.f32 %v2989_v12, 0.0  ;;  %v1590_v52 = vmax.f32 %v2993_v8, 0.0  ;;  %v1591_v7 = vmax.f32 %v2997_v38, 0.0  ;;  %v1592_v4 = vmax.f32 %v3001_v32, 0.0 }
 0x252   :  { %1639 = vst.msk [vmem:[#allocation2 + $0x40] sm:$0xff] %vm961_vm0, %v1575_v29  ;;  %1640 = vst.msk [vmem:[#allocation2 + $0x48] sm:$0xff] %vm961_vm0, %v1576_v2  ;;  %v1593_v3 = vmax.f32 %v3005_v63, 0.0  ;;  %v1594_v10 = vmax.f32 %v3009_v36, 0.0  ;;  %v1595_v16 = vmax.f32 %v3013_v41, 0.0  ;;  %v1596_v27 = vmax.f32 %v3017_v49, 0.0 }
 0x253   :  { %1641 = vst.msk [vmem:[#allocation2 + $0x50] sm:$0xff] %vm961_vm0, %v1577_v57  ;;  %1642 = vst.msk [vmem:[#allocation2 + $0x58] sm:$0xff] %vm961_vm0, %v1578_v28  ;;  %v1597_v56 = vmax.f32 %v3021_v45, 0.0  ;;  %v1598_v11 = vmax.f32 %v3025_v25, 0.0  ;;  %v1599_v42 = vmax.f32 %v3029_v48, 0.0  ;;  %v1600_v12 = vmax.f32 %v3033_v34, 0.0 }
 0x254   :  { %1643 = vst.msk [vmem:[#allocation2 + $0x60] sm:$0xff] %vm961_vm0, %v1579_v33  ;;  %1644 = vst.msk [vmem:[#allocation2 + $0x68] sm:$0xff] %vm961_vm0, %v1580_v58  ;;  %v1601_v8 = vmax.f32 %v3037_v60, 0.0  ;;  %v1602_v38 = vmax.f32 %v3041_v43, 0.0  ;;  %v1603_v32 = vmax.f32 %v3045_v40, 0.0  ;;  %v1604_v63 = vmax.f32 %v3049_v17, 0.0 }
 0x255   :  { %1645 = vst.msk [vmem:[#allocation2 + $0x70] sm:$0xff] %vm961_vm0, %v1581_v26  ;;  %1646 = vst.msk [vmem:[#allocation2 + $0x78] sm:$0xff] %vm961_vm0, %v1582_v19  ;;  %v1605_v36 = vmax.f32 %v3053_v31, 0.0  ;;  %v1606_v41 = vmax.f32 %v3057_v30, 0.0  ;;  %v1607_v49 = vmax.f32 %v3061_v22, 0.0  ;;  %v1608_v45 = vmax.f32 %v3065_v21, 0.0 }
 0x256   :  { %1647 = vst.msk [vmem:[#allocation2 + $0x80] sm:$0xff] %vm961_vm0, %v1583_v1  ;;  %1648 = vst.msk [vmem:[#allocation2 + $0x88] sm:$0xff] %vm961_vm0, %v1584_v6  ;;  %v1609_v25 = vmax.f32 %v3069_v35, 0.0  ;;  %v1610_v48 = vmax.f32 %v3073_v54, 0.0  ;;  %v1611_v34 = vmax.f32 %v3077_v44, 0.0  ;;  %v3433_v60 = vld [vmem:[#allocation7_spill] sm:$0xff] }
 0x257   :  { %1649 = vst.msk [vmem:[#allocation2 + $0x90] sm:$0xff] %vm961_vm0, %v1585_v20  ;;  %1650 = vst.msk [vmem:[#allocation2 + $0x98] sm:$0xff] %vm961_vm0, %v1586_v61  ;;  %v1612_v43 = vmax.f32 %v3433_v60, 0.0  ;;  %v1613_v40 = vmax.f32 %v3085_v5, 0.0  ;;  %v3434_v17 = vld [vmem:[#allocation8_spill] sm:$0xff]  ;;  %v3435_v30 = vld [vmem:[#allocation9_spill] sm:$0xff] }
 0x258   :  { %1651 = vst.msk [vmem:[#allocation2 + $0xa0] sm:$0xff] %vm961_vm0, %v1587_v47  ;;  %1652 = vst.msk [vmem:[#allocation2 + $0xa8] sm:$0xff] %vm961_vm0, %v1588_v46  ;;  %v1614_v31 = vmax.f32 %v3434_v17, 0.0  ;;  %v1615_v22 = vmax.f32 %v3435_v30, 0.0  ;;  %v3436_v21 = vld [vmem:[#allocation10_spill] sm:$0xff]  ;;  %v3437_v54 = vld [vmem:[#allocation12_spill] sm:$0xff] }
 0x259   :  { %1653 = vst.msk [vmem:[#allocation2 + $0xb0] sm:$0xff] %vm961_vm0, %v1589_v53  ;;  %1654 = vst.msk [vmem:[#allocation2 + $0xb8] sm:$0xff] %vm961_vm0, %v1590_v52  ;;  %v1616_v35 = vmax.f32 %v3436_v21, 0.0  ;;  %v1617_v44 = vmax.f32 %v3437_v54, 0.0  ;;  %v1618_v5 = vmax.f32 %v3105_v39, 0.0  ;;  %v1619_v9 = vmax.f32 %v3109_v24, 0.0 }
 0x25a   :  { %1655 = vst.msk [vmem:[#allocation2 + $0xc0] sm:$0xff] %vm961_vm0, %v1591_v7  ;;  %1656 = vst.msk [vmem:[#allocation2 + $0xc8] sm:$0xff] %vm961_vm0, %v1592_v4  ;;  %v1620_v15 = vmax.f32 %v3113_v37, 0.0  ;;  %v1621_v0 = vmax.f32 %v3117_v62, 0.0  ;;  %v1622_v13 = vmax.f32 %v3121_v51, 0.0  ;;  %v1623_v29 = vmax.f32 %v3125_v50, 0.0 }
 0x25b   :  { %1657 = vst.msk [vmem:[#allocation2 + $0xd0] sm:$0xff] %vm961_vm0, %v1593_v3  ;;  %1658 = vst.msk [vmem:[#allocation2 + $0xd8] sm:$0xff] %vm961_vm0, %v1594_v10  ;;  %v3438_v39 = vld [vmem:[#allocation11_spill] sm:$0xff]  ;;  %v3439_v55 = vld [vmem:[#allocation13_spill] sm:$0xff]  ;;  %v1630_v2 = vmax.f32 %v3149_v23, 0.0 }
 0x25c   :  { %1659 = vst.msk [vmem:[#allocation2 + $0xe0] sm:$0xff] %vm961_vm0, %v1595_v16  ;;  %1660 = vst.msk [vmem:[#allocation2 + $0xe8] sm:$0xff] %vm961_vm0, %v1596_v27  ;;  %v1624_v24 = vmax.f32 %v3438_v39, 0.0  ;;  %v1625_v18 = vmax.f32 %v3439_v55, 0.0  ;;  %v3440_v59 = vld [vmem:[#allocation14_spill] sm:$0xff]  ;;  %v3441_v14 = vld [vmem:[#allocation16_spill] sm:$0xff] }
 0x25d   :  { %1661 = vst.msk [vmem:[#allocation2 + $0xf0] sm:$0xff] %vm961_vm0, %v1597_v56  ;;  %1662 = vst.msk [vmem:[#allocation2 + $0xf8] sm:$0xff] %vm961_vm0, %v1598_v11  ;;  %v1626_v37 = vmax.f32 %v3440_v59, 0.0  ;;  %v1627_v62 = vmax.f32 %v3441_v14, 0.0  ;;  %v3442_v51 = vld [vmem:[#allocation15_spill] sm:$0xff] }
 0x25e   :  { %1663 = vst.msk [vmem:[#allocation2 + $0x100] sm:$0xff] %vm961_vm0, %v1599_v42  ;;  %1664 = vst.msk [vmem:[#allocation2 + $0x108] sm:$0xff] %vm961_vm0, %v1600_v12  ;;  %v1629_v50 = vmax.f32 %v3442_v51, 0.0 }
 0x25f   :  { %1665 = vst.msk [vmem:[#allocation2 + $0x110] sm:$0xff] %vm961_vm0, %v1601_v8  ;;  %1666 = vst.msk [vmem:[#allocation2 + $0x118] sm:$0xff] %vm961_vm0, %v1602_v38 }
 0x260   :  { %1667 = vst.msk [vmem:[#allocation2 + $0x120] sm:$0xff] %vm961_vm0, %v1603_v32  ;;  %1668 = vst.msk [vmem:[#allocation2 + $0x128] sm:$0xff] %vm961_vm0, %v1604_v63 }
 0x261   :  { %1669 = vst.msk [vmem:[#allocation2 + $0x130] sm:$0xff] %vm961_vm0, %v1605_v36  ;;  %1670 = vst.msk [vmem:[#allocation2 + $0x138] sm:$0xff] %vm961_vm0, %v1606_v41 }
 0x262   :  { %1671 = vst.msk [vmem:[#allocation2 + $0x140] sm:$0xff] %vm961_vm0, %v1607_v49  ;;  %1672 = vst.msk [vmem:[#allocation2 + $0x148] sm:$0xff] %vm961_vm0, %v1608_v45 }
 0x263   :  { %1673 = vst.msk [vmem:[#allocation2 + $0x150] sm:$0xff] %vm961_vm0, %v1609_v25  ;;  %1674 = vst.msk [vmem:[#allocation2 + $0x158] sm:$0xff] %vm961_vm0, %v1610_v48 }
 0x264   :  { %1675 = vst.msk [vmem:[#allocation2 + $0x160] sm:$0xff] %vm961_vm0, %v1611_v34  ;;  %1676 = vst.msk [vmem:[#allocation2 + $0x168] sm:$0xff] %vm961_vm0, %v1612_v43 }
 0x265   :  { %1677 = vst.msk [vmem:[#allocation2 + $0x170] sm:$0xff] %vm961_vm0, %v1613_v40  ;;  %1678 = vst.msk [vmem:[#allocation2 + $0x178] sm:$0xff] %vm961_vm0, %v1614_v31 }
 0x266   :  { %1679 = vst.msk [vmem:[#allocation2 + $0x180] sm:$0xff] %vm961_vm0, %v1615_v22  ;;  %1680 = vst.msk [vmem:[#allocation2 + $0x188] sm:$0xff] %vm961_vm0, %v1616_v35 }
 0x267   :  { %1681 = vst.msk [vmem:[#allocation2 + $0x190] sm:$0xff] %vm961_vm0, %v1617_v44  ;;  %1682 = vst.msk [vmem:[#allocation2 + $0x198] sm:$0xff] %vm961_vm0, %v1618_v5 }
 0x268   :  { %1683 = vst.msk [vmem:[#allocation2 + $0x1a0] sm:$0xff] %vm961_vm0, %v1619_v9  ;;  %1684 = vst.msk [vmem:[#allocation2 + $0x1a8] sm:$0xff] %vm961_vm0, %v1620_v15 }
 0x269   :  { %1685 = vst.msk [vmem:[#allocation2 + $0x1b0] sm:$0xff] %vm961_vm0, %v1621_v0  ;;  %1686 = vst.msk [vmem:[#allocation2 + $0x1b8] sm:$0xff] %vm961_vm0, %v1622_v13 }
 0x26a   :  { %1687 = vst.msk [vmem:[#allocation2 + $0x1c0] sm:$0xff] %vm961_vm0, %v1623_v29  ;;  %1688 = vst.msk [vmem:[#allocation2 + $0x1c8] sm:$0xff] %vm961_vm0, %v1624_v24 }
 0x26b   :  { %1689 = vst.msk [vmem:[#allocation2 + $0x1d0] sm:$0xff] %vm961_vm0, %v1625_v18  ;;  %1690 = vst.msk [vmem:[#allocation2 + $0x1d8] sm:$0xff] %vm961_vm0, %v1626_v37 }
 0x26c   :  { %1691 = vst.msk [vmem:[#allocation2 + $0x1e0] sm:$0xff] %vm961_vm0, %v1627_v62  ;;  %1693 = vst.msk [vmem:[#allocation2 + $0x1f0] sm:$0xff] %vm961_vm0, %v1629_v50 }
 0x26d   :  { %1694 = vst.msk [vmem:[#allocation2 + $0x1f8] sm:$0xff] %vm961_vm0, %v1630_v2 }
 0x26e   :  { %1944 = shalt.err (!%p1941_p4)
}
 0x26f   :  { %s1945_s27 = scalar_lea.hbm %s3301_s5, 8192 }
 0x270   :  { %p1946_p5 = scmp.ne.s32.totalorder %s3301_s5, %s1945_s27  ;;  %p1949_p6 = scmp.lt.u32.totalorder %s1945_s27, %s3301_s5 }
 0x272   :  { %p1951_p7 = pnand %p1949_p6, %p1946_p5 }
 0x274   :  { %1954 = shalt.err (!%p1951_p7)
}
 0x275   :  { %s1958_s7 = smov 128   ;;  %s1959_s8 = smov 8  }
 0x276   :  { %1706 = dma.vmem_to_hbm [thread:$0]  %s3265_s4, 8192, %s3301_s5, [#allocation3], %s1958_s7, %s1958_s7, %s1959_s8  }
 0x277   :  { %1955 = dma.done.wait [#allocation3], 8192  }
 0x278   :  { %1956 = vsyncadd [#allocation3], 4294959104 }
 0x279   :  { %1710 = vsyncpa [#allocation3], 1 }

</bundles_post_ra>
